<compile_context>
chip_gen: v7x
topology: tpu7x:2x2x1
jax: 0.10.0
libtpu: 0.0.40
codegen_flags: <defaults>
</compile_context>

<pallas_src>
import functools

import jax
import jax.numpy as jnp
from jax import lax
from jax.experimental import pallas as pl
from jax.experimental.pallas import tpu as pltpu

BN_EPS = 1e-5


def _is_first_step():
    return (pl.program_id(0) == 0) & (pl.program_id(1) == 0)


def _is_last_step():
    return ((pl.program_id(0) == pl.num_programs(0) - 1) &
            (pl.program_id(1) == pl.num_programs(1) - 1))


# ---------------------------------------------------------------------------
# Phase-1a kernel: accumulate per-channel [sum, sumsq] of h = W1 @ x.
# ---------------------------------------------------------------------------
def _stats_h_kernel(x_ref, w1_ref, o_ref, acc_ref):
    @pl.when(_is_first_step())
    def _():
        acc_ref[...] = jnp.zeros_like(acc_ref)

    x = x_ref[...]                                          # (C, lb) f32
    h = jnp.dot(w1_ref[...], x.astype(jnp.bfloat16),        # bf16 MXU, f32 acc
                preferred_element_type=jnp.float32)         # (H, lb)
    s = jnp.sum(h, axis=-1, keepdims=True)
    ss = jnp.sum(h * h, axis=-1, keepdims=True)
    acc_ref[...] += jnp.concatenate([s, ss], axis=-1)       # (H, 2)

    @pl.when(_is_last_step())
    def _():
        o_ref[...] = acc_ref[...]


# ---------------------------------------------------------------------------
# Phase-1b kernel: accumulate per-channel [sum, sumsq] of
#   y = W2 @ PReLU(BN1(W1 @ x))   (BN1 scale/shift precomputed by the wrapper).
# ---------------------------------------------------------------------------
def _stats_y_kernel(x_ref, w1_ref, s1_ref, w2_ref, alpha_ref, o_ref, acc_ref):
    @pl.when(_is_first_step())
    def _():
        acc_ref[...] = jnp.zeros_like(acc_ref)

    x = x_ref[...]                                          # (C, lb) f32
    h = jnp.dot(w1_ref[...], x.astype(jnp.bfloat16),
                preferred_element_type=jnp.float32)         # (H, lb) f32
    hn = h * s1_ref[:, 0:1] + s1_ref[:, 1:2]                # fused BN1
    a1 = alpha_ref[0]
    p = jnp.where(hn > 0, hn, a1 * hn)                      # PReLU1 (f32)
    y = jnp.dot(w2_ref[...], p.astype(jnp.bfloat16),
                preferred_element_type=jnp.float32)         # (C, lb) f32
    s = jnp.sum(y, axis=-1, keepdims=True)
    ss = jnp.sum(y * y, axis=-1, keepdims=True)
    acc_ref[...] += jnp.concatenate([s, ss], axis=-1)       # (C, 2)

    @pl.when(_is_last_step())
    def _():
        o_ref[...] = acc_ref[...]


# ---------------------------------------------------------------------------
# Phase-2 kernel: out = x + PReLU(BN2(W2 @ PReLU(BN1(W1 @ x)))).
# Fully parallel over (batch, lane tiles) -> megacore-friendly on v7x.
# ---------------------------------------------------------------------------
def _apply_kernel(x_ref, w1_ref, s1_ref, w2_ref, s2_ref, alpha_ref, o_ref):
    x = x_ref[...]                                          # (C, lb) f32
    h = jnp.dot(w1_ref[...], x.astype(jnp.bfloat16),
                preferred_element_type=jnp.float32)
    hn = h * s1_ref[:, 0:1] + s1_ref[:, 1:2]
    p = jnp.where(hn > 0, hn, alpha_ref[0] * hn)
    y = jnp.dot(w2_ref[...], p.astype(jnp.bfloat16),
                preferred_element_type=jnp.float32)
    yn = y * s2_ref[:, 0:1] + s2_ref[:, 1:2]
    q = jnp.where(yn > 0, yn, alpha_ref[1] * yn)
    o_ref[...] = (x + q).astype(o_ref.dtype)


def _pick_lane_tile(length, target=512, cap=8192):
    """Lane-tile width: a multiple of 128 dividing L, near `target` lanes.

    At production channel counts a larger target (~2048) amortizes per-step
    overhead better; 512 keeps small demos on a multi-tile grid.
    """
    if length % 128 != 0 or length <= target:
        return length
    divisors = [d for d in range(128, min(length, cap) + 1, 128)
                if length % d == 0]
    if not divisors:
        return length
    under = [d for d in divisors if d <= target]
    return under[-1] if under else divisors[0]


def residual_stack_pallas(x_ncl, params, n_res_layers, lane_block_target=512):
    """x_ncl: (N, C, L) float32.  Returns (N, C, L) float32."""
    N, C, L = x_ncl.shape
    H = params["w1"].shape[0]
    C_out = params["w2"].shape[0]
    assert C_out == C, "residual connection requires in_dim == out_dim"

    lb = _pick_lane_tile(L, target=lane_block_target)
    n_t = L // lb
    grid = (N, n_t)
    inv_m = 1.0 / float(N * L)

    # Weights cast to bf16 once (MXU inputs); everything elementwise stays f32.
    w1 = params["w1"].astype(jnp.bfloat16)                       # (H, C)
    w2 = params["w2"].astype(jnp.bfloat16)                       # (C, H)
    alphas = jnp.concatenate(
        [params["a1"].reshape(1), params["a2"].reshape(1)]).astype(jnp.float32)

    # BlockSpecs: activations streamed as lane-dense (C, lb) tiles straight out
    # of the NCL layout; weight/param tables resident (constant index maps).
    x_spec = pl.BlockSpec((None, C, lb), lambda n, t: (n, 0, t))
    w1_spec = pl.BlockSpec((H, C), lambda n, t: (0, 0))
    w2_spec = pl.BlockSpec((C, H), lambda n, t: (0, 0))
    s1_spec = pl.BlockSpec((H, 2), lambda n, t: (0, 0))
    s2_spec = pl.BlockSpec((C, 2), lambda n, t: (0, 0))
    alpha_spec = pl.BlockSpec(memory_space=pltpu.MemorySpace.SMEM)

    # VMEM budget from the actual per-step footprint (double-buffered streams
    # + resident params), clamped to stay under v7x's 64 MiB physical VMEM.
    tile_bytes = C * lb * 4
    est = 2 * 2 * tile_bytes + 2 * H * C * 2 + (H + C) * 2 * 4 + (H + C) * lb * 4
    vmem_limit = int(min(64 * 2**20, max(32 * 2**20, 8 * est)))

    reduce_params = pltpu.CompilerParams(
        dimension_semantics=("arbitrary", "arbitrary"),
        vmem_limit_bytes=vmem_limit)
    parallel_params = pltpu.CompilerParams(
        dimension_semantics=("parallel", "parallel"),   # megacore on v7x
        vmem_limit_bytes=vmem_limit)

    stats_h_call = pl.pallas_call(
        _stats_h_kernel,
        grid=grid,
        in_specs=[x_spec, w1_spec],
        out_specs=pl.BlockSpec((H, 2), lambda n, t: (0, 0)),
        out_shape=jax.ShapeDtypeStruct((H, 2), jnp.float32),
        scratch_shapes=[pltpu.VMEM((H, 2), jnp.float32)],
        compiler_params=reduce_params)

    stats_y_call = pl.pallas_call(
        _stats_y_kernel,
        grid=grid,
        in_specs=[x_spec, w1_spec, s1_spec, w2_spec, alpha_spec],
        out_specs=pl.BlockSpec((C, 2), lambda n, t: (0, 0)),
        out_shape=jax.ShapeDtypeStruct((C, 2), jnp.float32),
        scratch_shapes=[pltpu.VMEM((C, 2), jnp.float32)],
        compiler_params=reduce_params)

    apply_call = pl.pallas_call(
        _apply_kernel,
        grid=grid,
        in_specs=[x_spec, w1_spec, s1_spec, w2_spec, s2_spec, alpha_spec],
        out_specs=pl.BlockSpec((None, C, lb), lambda n, t: (n, 0, t)),
        out_shape=jax.ShapeDtypeStruct((N, C, L), x_ncl.dtype),
        input_output_aliases={0: 0},      # reuse the activation HBM buffer
        compiler_params=parallel_params)

    def scale_shift(sums, gamma, beta):
        # Train-mode BN: biased batch stats folded into one scale/shift pair.
        mean = sums[:, 0] * inv_m
        var = jnp.maximum(sums[:, 1] * inv_m - mean * mean, 0.0)
        scale = gamma * lax.rsqrt(var + BN_EPS)
        shift = beta - mean * scale
        return jnp.stack([scale, shift], axis=-1).astype(jnp.float32)

    x = x_ncl
    for _ in range(n_res_layers):   # shared weights: ModuleList([layer] * n)
        sh = stats_h_call(x, w1)                                    # (H, 2)
        s1 = scale_shift(sh, params["g1"], params["be1"])
        sy = stats_y_call(x, w1, s1, w2, alphas)                    # (C, 2)
        s2 = scale_shift(sy, params["g2"], params["be2"])
        x = apply_call(x, w1, s1, w2, s2, alphas)                   # (N, C, L)
    return x


def residual_stack_ref(x_ncl, params, n_res_layers):
    """Pure-JAX f32 reference (same train-mode BN semantics, WITH conv biases)."""
    N, C, L = x_ncl.shape
    x = jnp.transpose(x_ncl, (0, 2, 1)).reshape(N * L, C)
    for _ in range(n_res_layers):
        h = x @ params["w1"].T + params["b1"]
        m = h.mean(axis=0, keepdims=True)
        v = ((h - m) ** 2).mean(axis=0, keepdims=True)
        h = (h - m) / jnp.sqrt(v + BN_EPS) * params["g1"] + params["be1"]
        h = jnp.where(h > 0, h, params["a1"] * h)
        y = h @ params["w2"].T + params["b2"]
        m = y.mean(axis=0, keepdims=True)
        v = ((y - m) ** 2).mean(axis=0, keepdims=True)
        y = (y - m) / jnp.sqrt(v + BN_EPS) * params["g2"] + params["be2"]
        y = jnp.where(y > 0, y, params["a2"] * y)
        x = x + y
    return x.reshape(N, L, C).transpose(0, 2, 1)


def init_params(key, in_dim, out_dim, res_h_dim):
    ks = jax.random.split(key, 8)
    return {
        # Conv1d weights are (out_ch, in_ch, 1) in torch; k=1 -> (out_ch, in_ch).
        "w1": jax.random.normal(ks[0], (res_h_dim, in_dim), jnp.float32) * 0.3,
        "b1": jax.random.normal(ks[1], (res_h_dim,), jnp.float32) * 0.1,
        "g1": 1.0 + 0.1 * jax.random.normal(ks[2], (res_h_dim,), jnp.float32),
        "be1": 0.1 * jax.random.normal(ks[3], (res_h_dim,), jnp.float32),
        "a1": jnp.asarray([0.25], jnp.float32),          # PReLU default init
        "w2": jax.random.normal(ks[4], (out_dim, res_h_dim), jnp.float32) * 0.3,
        "b2": jax.random.normal(ks[5], (out_dim,), jnp.float32) * 0.1,
        "g2": 1.0 + 0.1 * jax.random.normal(ks[6], (out_dim,), jnp.float32),
        "be2": 0.1 * jax.random.normal(ks[7], (out_dim,), jnp.float32),
        "a2": jnp.asarray([0.25], jnp.float32),
    }


if __name__ == "__main__":
    # Residual connection requires in_dim == out_dim.  L = 1024 keeps the demo
    # small (2 MB) while exercising lane-dense 512-wide tiles and a real
    # (batch, lane-tile) accumulation grid.
    batch, in_dim, out_dim, res_h_dim, length, n_res_layers = 4, 32, 32, 16, 1024, 3

    key = jax.random.PRNGKey(0)
    k_x, k_p = jax.random.split(key)
    x = jax.random.normal(k_x, (batch, in_dim, length), jnp.float32)
    params = init_params(k_p, in_dim, out_dim, res_h_dim)

    fn = jax.jit(functools.partial(residual_stack_pallas, n_res_layers=n_res_layers))
    out = jax.block_until_ready(fn(x, params))

    ref = residual_stack_ref(x, params, n_res_layers)
    assert out.shape == (batch, out_dim, length)
    # bf16 MXU inputs (f32 accumulation) drift a little vs the all-f32
    # reference across 3 residual layers, hence the loosened tolerance.
    max_err = float(jnp.max(jnp.abs(out - ref)))
    assert jnp.allclose(out, ref, atol=1e-1, rtol=5e-2), (
        f"mismatch vs JAX reference, max|diff|={max_err}")

    print("KERNEL_OK")
</pallas_src>

<mosaic_0001>
module attributes {stable_mosaic.version = 11 : i64} {
  func.func @_stats_h_kernel(%arg0: i32, %arg1: i32, %arg2: memref<1x32x512xf32, #tpu.memory_space<vmem>>, %arg3: memref<16x32xbf16, #tpu.memory_space<vmem>>, %arg4: memref<16x2xf32, #tpu.memory_space<vmem>>, %arg5: memref<16x2xf32, #tpu.memory_space<vmem>>) attributes {dimension_semantics = [#tpu.dimension_semantics<arbitrary>, #tpu.dimension_semantics<arbitrary>], iteration_bounds = array<i64: 4, 2>, scalar_prefetch = 0 : i64, scratch_operands = 1 : i64, tpu.core_type = #tpu.core_type<tc>, window_params = [{transform_indices = @transform_0, window_bounds = array<i64: 1, 32, 512>}, {pipeline_mode = #tpu.pipeline_mode<synchronous>, transform_indices = @transform_1, window_bounds = array<i64: 16, 32>}, {pipeline_mode = #tpu.pipeline_mode<synchronous>, transform_indices = @transform_2, window_bounds = array<i64: 16, 2>}]} {
    %c0_i32 = arith.constant 0 : i32
    %0 = arith.cmpi eq, %arg0, %c0_i32 : i32
    %c0_i32_0 = arith.constant 0 : i32
    %1 = arith.cmpi eq, %arg1, %c0_i32_0 : i32
    %2 = arith.andi %0, %1 : i1
    %3 = arith.extui %2 : i1 to i32
    %c0_i32_1 = arith.constant 0 : i32
    %4 = arith.cmpi ne, %3, %c0_i32_1 : i32
    scf.if %4 {
      %cst_13 = arith.constant 0.000000e+00 : f32
      %24 = vector.broadcast %cst_13 : f32 to vector<16x2xf32>
      %c0_14 = arith.constant 0 : index
      %c0_15 = arith.constant 0 : index
      %25 = vector.load %arg5[%c0_14, %c0_15] : memref<16x2xf32, #tpu.memory_space<vmem>>, vector<16x2xf32>
      tpu.vector_store %arg5[%c0_14, %c0_15], %24 {strides = array<i32>} : memref<16x2xf32, #tpu.memory_space<vmem>>, vector<16x2xf32>,
    } else {
    }
    %c0 = arith.constant 0 : index
    %c0_2 = arith.constant 0 : index
    %c0_3 = arith.constant 0 : index
    %5 = vector.load %arg2[%c0, %c0_2, %c0_3] : memref<1x32x512xf32, #tpu.memory_space<vmem>>, vector<1x32x512xf32>
    %6 = vector.shape_cast %5 : vector<1x32x512xf32> to vector<32x512xf32>
    %c0_4 = arith.constant 0 : index
    %c0_5 = arith.constant 0 : index
    %7 = vector.load %arg3[%c0_4, %c0_5] : memref<16x32xbf16, #tpu.memory_space<vmem>>, vector<16x32xbf16>
    %8 = arith.truncf %6 : vector<32x512xf32> to vector<32x512xbf16>
    %cst = arith.constant dense<0.000000e+00> : vector<16x512xf32>
    %9 = tpu.matmul %7, %8, %cst {dimension_numbers = #tpu.dot_dimension_numbers<[1], [0], [0], [1], [0, 0, 1, 1], [], []>} : vector<16x32xbf16>, vector<32x512xbf16>, vector<16x512xf32> -> vector<16x512xf32>
    %cst_6 = arith.constant dense<0.000000e+00> : vector<16xf32>
    %10 = vector.multi_reduction <add>, %9, %cst_6 [1] : vector<16x512xf32> to vector<16xf32>
    %11 = vector.shape_cast %10 : vector<16xf32> to vector<16x1xf32>
    %12 = arith.mulf %9, %9 : vector<16x512xf32>
    %cst_7 = arith.constant dense<0.000000e+00> : vector<16xf32>
    %13 = vector.multi_reduction <add>, %12, %cst_7 [1] : vector<16x512xf32> to vector<16xf32>
    %14 = vector.shape_cast %13 : vector<16xf32> to vector<16x1xf32>
    %c0_8 = arith.constant 0 : index
    %c0_9 = arith.constant 0 : index
    %15 = vector.load %arg5[%c0_8, %c0_9] : memref<16x2xf32, #tpu.memory_space<vmem>>, vector<16x2xf32>
    %16 = tpu.concatenate %11, %14 in 1 : vector<16x1xf32>, vector<16x1xf32> -> vector<16x2xf32>
    %17 = arith.addf %15, %16 : vector<16x2xf32>
    %c0_10 = arith.constant 0 : index
    %c0_11 = arith.constant 0 : index
    %18 = vector.load %arg5[%c0_10, %c0_11] : memref<16x2xf32, #tpu.memory_space<vmem>>, vector<16x2xf32>
    tpu.vector_store %arg5[%c0_10, %c0_11], %17 {strides = array<i32>} : memref<16x2xf32, #tpu.memory_space<vmem>>, vector<16x2xf32>,
    %c3_i32 = arith.constant 3 : i32
    %19 = arith.cmpi eq, %arg0, %c3_i32 : i32
    %c1_i32 = arith.constant 1 : i32
    %20 = arith.cmpi eq, %arg1, %c1_i32 : i32
    %21 = arith.andi %19, %20 : i1
    %22 = arith.extui %21 : i1 to i32
    %c0_i32_12 = arith.constant 0 : i32
    %23 = arith.cmpi ne, %22, %c0_i32_12 : i32
    scf.if %23 {
      %c0_13 = arith.constant 0 : index
      %c0_14 = arith.constant 0 : index
      %24 = vector.load %arg5[%c0_13, %c0_14] : memref<16x2xf32, #tpu.memory_space<vmem>>, vector<16x2xf32>
      %c0_15 = arith.constant 0 : index
      %c0_16 = arith.constant 0 : index
      %25 = vector.load %arg4[%c0_15, %c0_16] : memref<16x2xf32, #tpu.memory_space<vmem>>, vector<16x2xf32>
      tpu.vector_store %arg4[%c0_15, %c0_16], %24 {strides = array<i32>} : memref<16x2xf32, #tpu.memory_space<vmem>>, vector<16x2xf32>,
    } else {
    }
    return
  }
  func.func @transform_0(%arg0: i32, %arg1: i32) -> (i32, i32, i32) {
    %c0_i32 = arith.constant 0 : i32
    %c0_i32_0 = arith.constant 0 : i32
    return %arg0, %c0_i32, %arg1 : i32, i32, i32
  }
  func.func @transform_1(%arg0: i32, %arg1: i32) -> (i32, i32) {
    %c0_i32 = arith.constant 0 : i32
    %c0_i32_0 = arith.constant 0 : i32
    %c0_i32_1 = arith.constant 0 : i32
    return %c0_i32, %c0_i32_0 : i32, i32
  }
  func.func @transform_2(%arg0: i32, %arg1: i32) -> (i32, i32) {
    %c0_i32 = arith.constant 0 : i32
    %c0_i32_0 = arith.constant 0 : i32
    %c0_i32_1 = arith.constant 0 : i32
    return %c0_i32, %c0_i32_0 : i32, i32
  }
}

module attributes {stable_mosaic.version = 11 : i64} {
  func.func @_stats_y_kernel(%arg0: i32, %arg1: i32, %arg2: memref<1x32x512xf32, #tpu.memory_space<vmem>>, %arg3: memref<16x32xbf16, #tpu.memory_space<vmem>>, %arg4: memref<16x2xf32, #tpu.memory_space<vmem>>, %arg5: memref<32x16xbf16, #tpu.memory_space<vmem>>, %arg6: memref<2xf32, #tpu.memory_space<smem>>, %arg7: memref<32x2xf32, #tpu.memory_space<vmem>>, %arg8: memref<32x2xf32, #tpu.memory_space<vmem>>) attributes {dimension_semantics = [#tpu.dimension_semantics<arbitrary>, #tpu.dimension_semantics<arbitrary>], iteration_bounds = array<i64: 4, 2>, scalar_prefetch = 0 : i64, scratch_operands = 1 : i64, tpu.core_type = #tpu.core_type<tc>, window_params = [{transform_indices = @transform_0, window_bounds = array<i64: 1, 32, 512>}, {pipeline_mode = #tpu.pipeline_mode<synchronous>, transform_indices = @transform_1, window_bounds = array<i64: 16, 32>}, {pipeline_mode = #tpu.pipeline_mode<synchronous>, transform_indices = @transform_2, window_bounds = array<i64: 16, 2>}, {pipeline_mode = #tpu.pipeline_mode<synchronous>, transform_indices = @transform_3, window_bounds = array<i64: 32, 16>}, {transform_indices = @transform_4, window_bounds = array<i64: 2>}, {pipeline_mode = #tpu.pipeline_mode<synchronous>, transform_indices = @transform_5, window_bounds = array<i64: 32, 2>}]} {
    %c0_i32 = arith.constant 0 : i32
    %0 = arith.cmpi eq, %arg0, %c0_i32 : i32
    %c0_i32_0 = arith.constant 0 : i32
    %1 = arith.cmpi eq, %arg1, %c0_i32_0 : i32
    %2 = arith.andi %0, %1 : i1
    %3 = arith.extui %2 : i1 to i32
    %c0_i32_1 = arith.constant 0 : i32
    %4 = arith.cmpi ne, %3, %c0_i32_1 : i32
    scf.if %4 {
      %cst_21 = arith.constant 0.000000e+00 : f32
      %39 = vector.broadcast %cst_21 : f32 to vector<32x2xf32>
      %c0_22 = arith.constant 0 : index
      %c0_23 = arith.constant 0 : index
      %40 = vector.load %arg8[%c0_22, %c0_23] : memref<32x2xf32, #tpu.memory_space<vmem>>, vector<32x2xf32>
      tpu.vector_store %arg8[%c0_22, %c0_23], %39 {strides = array<i32>} : memref<32x2xf32, #tpu.memory_space<vmem>>, vector<32x2xf32>,
    } else {
    }
    %c0 = arith.constant 0 : index
    %c0_2 = arith.constant 0 : index
    %c0_3 = arith.constant 0 : index
    %5 = vector.load %arg2[%c0, %c0_2, %c0_3] : memref<1x32x512xf32, #tpu.memory_space<vmem>>, vector<1x32x512xf32>
    %6 = vector.shape_cast %5 : vector<1x32x512xf32> to vector<32x512xf32>
    %c0_4 = arith.constant 0 : index
    %c0_5 = arith.constant 0 : index
    %7 = vector.load %arg3[%c0_4, %c0_5] : memref<16x32xbf16, #tpu.memory_space<vmem>>, vector<16x32xbf16>
    %8 = arith.truncf %6 : vector<32x512xf32> to vector<32x512xbf16>
    %cst = arith.constant dense<0.000000e+00> : vector<16x512xf32>
    %9 = tpu.matmul %7, %8, %cst {dimension_numbers = #tpu.dot_dimension_numbers<[1], [0], [0], [1], [0, 0, 1, 1], [], []>} : vector<16x32xbf16>, vector<32x512xbf16>, vector<16x512xf32> -> vector<16x512xf32>
    %c0_6 = arith.constant 0 : index
    %c0_7 = arith.constant 0 : index
    %10 = vector.load %arg4[%c0_6, %c0_7] : memref<16x2xf32, #tpu.memory_space<vmem>>, vector<16x1xf32>
    %11 = vector.broadcast %10 : vector<16x1xf32> to vector<16x512xf32>
    %12 = arith.mulf %9, %11 : vector<16x512xf32>
    %c0_8 = arith.constant 0 : index
    %c1 = arith.constant 1 : index
    %13 = vector.load %arg4[%c0_8, %c1] : memref<16x2xf32, #tpu.memory_space<vmem>>, vector<16x1xf32>
    %14 = vector.broadcast %13 : vector<16x1xf32> to vector<16x512xf32>
    %15 = arith.addf %12, %14 : vector<16x512xf32>
    %c0_9 = arith.constant 0 : index
    %16 = memref.load %arg6[%c0_9] : memref<2xf32, #tpu.memory_space<smem>>
    %cst_10 = arith.constant 0.000000e+00 : f32
    %17 = vector.broadcast %cst_10 : f32 to vector<16x512xf32>
    %18 = arith.cmpf ogt, %15, %17 : vector<16x512xf32>
    %19 = vector.broadcast %16 : f32 to vector<16x512xf32>
    %20 = arith.mulf %19, %15 : vector<16x512xf32>
    %21 = arith.select %18, %15, %20 : vector<16x512xi1>, vector<16x512xf32>
    %c0_11 = arith.constant 0 : index
    %c0_12 = arith.constant 0 : index
    %22 = vector.load %arg5[%c0_11, %c0_12] : memref<32x16xbf16, #tpu.memory_space<vmem>>, vector<32x16xbf16>
    %23 = arith.truncf %21 : vector<16x512xf32> to vector<16x512xbf16>
    %cst_13 = arith.constant dense<0.000000e+00> : vector<32x512xf32>
    %24 = tpu.matmul %22, %23, %cst_13 {dimension_numbers = #tpu.dot_dimension_numbers<[1], [0], [0], [1], [0, 0, 1, 1], [], []>} : vector<32x16xbf16>, vector<16x512xbf16>, vector<32x512xf32> -> vector<32x512xf32>
    %cst_14 = arith.constant dense<0.000000e+00> : vector<32xf32>
    %25 = vector.multi_reduction <add>, %24, %cst_14 [1] : vector<32x512xf32> to vector<32xf32>
    %26 = vector.shape_cast %25 : vector<32xf32> to vector<32x1xf32>
    %27 = arith.mulf %24, %24 : vector<32x512xf32>
    %cst_15 = arith.constant dense<0.000000e+00> : vector<32xf32>
    %28 = vector.multi_reduction <add>, %27, %cst_15 [1] : vector<32x512xf32> to vector<32xf32>
    %29 = vector.shape_cast %28 : vector<32xf32> to vector<32x1xf32>
    %c0_16 = arith.constant 0 : index
    %c0_17 = arith.constant 0 : index
    %30 = vector.load %arg8[%c0_16, %c0_17] : memref<32x2xf32, #tpu.memory_space<vmem>>, vector<32x2xf32>
    %31 = tpu.concatenate %26, %29 in 1 : vector<32x1xf32>, vector<32x1xf32> -> vector<32x2xf32>
    %32 = arith.addf %30, %31 : vector<32x2xf32>
    %c0_18 = arith.constant 0 : index
    %c0_19 = arith.constant 0 : index
    %33 = vector.load %arg8[%c0_18, %c0_19] : memref<32x2xf32, #tpu.memory_space<vmem>>, vector<32x2xf32>
    tpu.vector_store %arg8[%c0_18, %c0_19], %32 {strides = array<i32>} : memref<32x2xf32, #tpu.memory_space<vmem>>, vector<32x2xf32>,
    %c3_i32 = arith.constant 3 : i32
    %34 = arith.cmpi eq, %arg0, %c3_i32 : i32
    %c1_i32 = arith.constant 1 : i32
    %35 = arith.cmpi eq, %arg1, %c1_i32 : i32
    %36 = arith.andi %34, %35 : i1
    %37 = arith.extui %36 : i1 to i32
    %c0_i32_20 = arith.constant 0 : i32
    %38 = arith.cmpi ne, %37, %c0_i32_20 : i32
    scf.if %38 {
      %c0_21 = arith.constant 0 : index
      %c0_22 = arith.constant 0 : index
      %39 = vector.load %arg8[%c0_21, %c0_22] : memref<32x2xf32, #tpu.memory_space<vmem>>, vector<32x2xf32>
      %c0_23 = arith.constant 0 : index
      %c0_24 = arith.constant 0 : index
      %40 = vector.load %arg7[%c0_23, %c0_24] : memref<32x2xf32, #tpu.memory_space<vmem>>, vector<32x2xf32>
      tpu.vector_store %arg7[%c0_23, %c0_24], %39 {strides = array<i32>} : memref<32x2xf32, #tpu.memory_space<vmem>>, vector<32x2xf32>,
    } else {
    }
    return
  }
  func.func @transform_0(%arg0: i32, %arg1: i32) -> (i32, i32, i32) {
    %c0_i32 = arith.constant 0 : i32
    %c0_i32_0 = arith.constant 0 : i32
    return %arg0, %c0_i32, %arg1 : i32, i32, i32
  }
  func.func @transform_1(%arg0: i32, %arg1: i32) -> (i32, i32) {
    %c0_i32 = arith.constant 0 : i32
    %c0_i32_0 = arith.constant 0 : i32
    %c0_i32_1 = arith.constant 0 : i32
    return %c0_i32, %c0_i32_0 : i32, i32
  }
  func.func @transform_2(%arg0: i32, %arg1: i32) -> (i32, i32) {
    %c0_i32 = arith.constant 0 : i32
    %c0_i32_0 = arith.constant 0 : i32
    %c0_i32_1 = arith.constant 0 : i32
    return %c0_i32, %c0_i32_0 : i32, i32
  }
  func.func @transform_3(%arg0: i32, %arg1: i32) -> (i32, i32) {
    %c0_i32 = arith.constant 0 : i32
    %c0_i32_0 = arith.constant 0 : i32
    %c0_i32_1 = arith.constant 0 : i32
    return %c0_i32, %c0_i32_0 : i32, i32
  }
  func.func @transform_4(%arg0: i32, %arg1: i32) -> i32 {
    %c0_i32 = arith.constant 0 : i32
    %c0_i32_0 = arith.constant 0 : i32
    return %c0_i32 : i32
  }
  func.func @transform_5(%arg0: i32, %arg1: i32) -> (i32, i32) {
    %c0_i32 = arith.constant 0 : i32
    %c0_i32_0 = arith.constant 0 : i32
    %c0_i32_1 = arith.constant 0 : i32
    return %c0_i32, %c0_i32_0 : i32, i32
  }
}

module attributes {stable_mosaic.version = 11 : i64} {
  func.func @_apply_kernel(%arg0: i32, %arg1: i32, %arg2: memref<1x32x512xf32, #tpu.memory_space<vmem>>, %arg3: memref<16x32xbf16, #tpu.memory_space<vmem>>, %arg4: memref<16x2xf32, #tpu.memory_space<vmem>>, %arg5: memref<32x16xbf16, #tpu.memory_space<vmem>>, %arg6: memref<32x2xf32, #tpu.memory_space<vmem>>, %arg7: memref<2xf32, #tpu.memory_space<smem>>, %arg8: memref<1x32x512xf32, #tpu.memory_space<vmem>>) attributes {dimension_semantics = [#tpu.dimension_semantics<parallel>, #tpu.dimension_semantics<parallel>], iteration_bounds = array<i64: 4, 2>, scalar_prefetch = 0 : i64, scratch_operands = 0 : i64, tpu.core_type = #tpu.core_type<tc>, window_params = [{transform_indices = @transform_0, window_bounds = array<i64: 1, 32, 512>}, {pipeline_mode = #tpu.pipeline_mode<synchronous>, transform_indices = @transform_1, window_bounds = array<i64: 16, 32>}, {pipeline_mode = #tpu.pipeline_mode<synchronous>, transform_indices = @transform_2, window_bounds = array<i64: 16, 2>}, {pipeline_mode = #tpu.pipeline_mode<synchronous>, transform_indices = @transform_3, window_bounds = array<i64: 32, 16>}, {pipeline_mode = #tpu.pipeline_mode<synchronous>, transform_indices = @transform_4, window_bounds = array<i64: 32, 2>}, {transform_indices = @transform_5, window_bounds = array<i64: 2>}, {transform_indices = @transform_6, window_bounds = array<i64: 1, 32, 512>}]} {
    %c0 = arith.constant 0 : index
    %c0_0 = arith.constant 0 : index
    %c0_1 = arith.constant 0 : index
    %0 = vector.load %arg2[%c0, %c0_0, %c0_1] : memref<1x32x512xf32, #tpu.memory_space<vmem>>, vector<1x32x512xf32>
    %1 = vector.shape_cast %0 : vector<1x32x512xf32> to vector<32x512xf32>
    %c0_2 = arith.constant 0 : index
    %c0_3 = arith.constant 0 : index
    %2 = vector.load %arg3[%c0_2, %c0_3] : memref<16x32xbf16, #tpu.memory_space<vmem>>, vector<16x32xbf16>
    %3 = arith.truncf %1 : vector<32x512xf32> to vector<32x512xbf16>
    %cst = arith.constant dense<0.000000e+00> : vector<16x512xf32>
    %4 = tpu.matmul %2, %3, %cst {dimension_numbers = #tpu.dot_dimension_numbers<[1], [0], [0], [1], [0, 0, 1, 1], [], []>} : vector<16x32xbf16>, vector<32x512xbf16>, vector<16x512xf32> -> vector<16x512xf32>
    %c0_4 = arith.constant 0 : index
    %c0_5 = arith.constant 0 : index
    %5 = vector.load %arg4[%c0_4, %c0_5] : memref<16x2xf32, #tpu.memory_space<vmem>>, vector<16x1xf32>
    %6 = vector.broadcast %5 : vector<16x1xf32> to vector<16x512xf32>
    %7 = arith.mulf %4, %6 : vector<16x512xf32>
    %c0_6 = arith.constant 0 : index
    %c1 = arith.constant 1 : index
    %8 = vector.load %arg4[%c0_6, %c1] : memref<16x2xf32, #tpu.memory_space<vmem>>, vector<16x1xf32>
    %9 = vector.broadcast %8 : vector<16x1xf32> to vector<16x512xf32>
    %10 = arith.addf %7, %9 : vector<16x512xf32>
    %cst_7 = arith.constant 0.000000e+00 : f32
    %11 = vector.broadcast %cst_7 : f32 to vector<16x512xf32>
    %12 = arith.cmpf ogt, %10, %11 : vector<16x512xf32>
    %c0_8 = arith.constant 0 : index
    %13 = memref.load %arg7[%c0_8] : memref<2xf32, #tpu.memory_space<smem>>
    %14 = vector.broadcast %13 : f32 to vector<16x512xf32>
    %15 = arith.mulf %14, %10 : vector<16x512xf32>
    %16 = arith.select %12, %10, %15 : vector<16x512xi1>, vector<16x512xf32>
    %c0_9 = arith.constant 0 : index
    %c0_10 = arith.constant 0 : index
    %17 = vector.load %arg5[%c0_9, %c0_10] : memref<32x16xbf16, #tpu.memory_space<vmem>>, vector<32x16xbf16>
    %18 = arith.truncf %16 : vector<16x512xf32> to vector<16x512xbf16>
    %cst_11 = arith.constant dense<0.000000e+00> : vector<32x512xf32>
    %19 = tpu.matmul %17, %18, %cst_11 {dimension_numbers = #tpu.dot_dimension_numbers<[1], [0], [0], [1], [0, 0, 1, 1], [], []>} : vector<32x16xbf16>, vector<16x512xbf16>, vector<32x512xf32> -> vector<32x512xf32>
    %c0_12 = arith.constant 0 : index
    %c0_13 = arith.constant 0 : index
    %20 = vector.load %arg6[%c0_12, %c0_13] : memref<32x2xf32, #tpu.memory_space<vmem>>, vector<32x1xf32>
    %21 = vector.broadcast %20 : vector<32x1xf32> to vector<32x512xf32>
    %22 = arith.mulf %19, %21 : vector<32x512xf32>
    %c0_14 = arith.constant 0 : index
    %c1_15 = arith.constant 1 : index
    %23 = vector.load %arg6[%c0_14, %c1_15] : memref<32x2xf32, #tpu.memory_space<vmem>>, vector<32x1xf32>
    %24 = vector.broadcast %23 : vector<32x1xf32> to vector<32x512xf32>
    %25 = arith.addf %22, %24 : vector<32x512xf32>
    %cst_16 = arith.constant 0.000000e+00 : f32
    %26 = vector.broadcast %cst_16 : f32 to vector<32x512xf32>
    %27 = arith.cmpf ogt, %25, %26 : vector<32x512xf32>
    %c1_17 = arith.constant 1 : index
    %28 = memref.load %arg7[%c1_17] : memref<2xf32, #tpu.memory_space<smem>>
    %29 = vector.broadcast %28 : f32 to vector<32x512xf32>
    %30 = arith.mulf %29, %25 : vector<32x512xf32>
    %31 = arith.select %27, %25, %30 : vector<32x512xi1>, vector<32x512xf32>
    %32 = arith.addf %1, %31 : vector<32x512xf32>
    %c0_18 = arith.constant 0 : index
    %c0_19 = arith.constant 0 : index
    %c0_20 = arith.constant 0 : index
    %33 = vector.load %arg8[%c0_18, %c0_19, %c0_20] : memref<1x32x512xf32, #tpu.memory_space<vmem>>, vector<1x32x512xf32>
    %34 = vector.shape_cast %33 : vector<1x32x512xf32> to vector<32x512xf32>
    %35 = vector.shape_cast %32 : vector<32x512xf32> to vector<1x32x512xf32>
    tpu.vector_store %arg8[%c0_18, %c0_19, %c0_20], %35 {strides = array<i32>} : memref<1x32x512xf32, #tpu.memory_space<vmem>>, vector<1x32x512xf32>,
    return
  }
  func.func @transform_0(%arg0: i32, %arg1: i32) -> (i32, i32, i32) {
    %c0_i32 = arith.constant 0 : i32
    %c0_i32_0 = arith.constant 0 : i32
    return %arg0, %c0_i32, %arg1 : i32, i32, i32
  }
  func.func @transform_1(%arg0: i32, %arg1: i32) -> (i32, i32) {
    %c0_i32 = arith.constant 0 : i32
    %c0_i32_0 = arith.constant 0 : i32
    %c0_i32_1 = arith.constant 0 : i32
    return %c0_i32, %c0_i32_0 : i32, i32
  }
  func.func @transform_2(%arg0: i32, %arg1: i32) -> (i32, i32) {
    %c0_i32 = arith.constant 0 : i32
    %c0_i32_0 = arith.constant 0 : i32
    %c0_i32_1 = arith.constant 0 : i32
    return %c0_i32, %c0_i32_0 : i32, i32
  }
  func.func @transform_3(%arg0: i32, %arg1: i32) -> (i32, i32) {
    %c0_i32 = arith.constant 0 : i32
    %c0_i32_0 = arith.constant 0 : i32
    %c0_i32_1 = arith.constant 0 : i32
    return %c0_i32, %c0_i32_0 : i32, i32
  }
  func.func @transform_4(%arg0: i32, %arg1: i32) -> (i32, i32) {
    %c0_i32 = arith.constant 0 : i32
    %c0_i32_0 = arith.constant 0 : i32
    %c0_i32_1 = arith.constant 0 : i32
    return %c0_i32, %c0_i32_0 : i32, i32
  }
  func.func @transform_5(%arg0: i32, %arg1: i32) -> i32 {
    %c0_i32 = arith.constant 0 : i32
    %c0_i32_0 = arith.constant 0 : i32
    return %c0_i32 : i32
  }
  func.func @transform_6(%arg0: i32, %arg1: i32) -> (i32, i32, i32) {
    %c0_i32 = arith.constant 0 : i32
    %c0_i32_0 = arith.constant 0 : i32
    return %arg0, %c0_i32, %arg1 : i32, i32, i32
  }
}

module attributes {stable_mosaic.version = 11 : i64} {
  func.func @_apply_kernel(%arg0: i32, %arg1: i32, %arg2: memref<1x32x512xf32, #tpu.memory_space<vmem>>, %arg3: memref<16x32xbf16, #tpu.memory_space<vmem>>, %arg4: memref<16x2xf32, #tpu.memory_space<vmem>>, %arg5: memref<32x16xbf16, #tpu.memory_space<vmem>>, %arg6: memref<32x2xf32, #tpu.memory_space<vmem>>, %arg7: memref<2xf32, #tpu.memory_space<smem>>, %arg8: memref<1x32x512xf32, #tpu.memory_space<vmem>>) attributes {dimension_semantics = [#tpu.dimension_semantics<parallel>, #tpu.dimension_semantics<parallel>], iteration_bounds = array<i64: 4, 2>, scalar_prefetch = 0 : i64, scratch_operands = 0 : i64, tpu.core_type = #tpu.core_type<tc>, window_params = [{transform_indices = @transform_0, window_bounds = array<i64: 1, 32, 512>}, {pipeline_mode = #tpu.pipeline_mode<synchronous>, transform_indices = @transform_1, window_bounds = array<i64: 16, 32>}, {pipeline_mode = #tpu.pipeline_mode<synchronous>, transform_indices = @transform_2, window_bounds = array<i64: 16, 2>}, {pipeline_mode = #tpu.pipeline_mode<synchronous>, transform_indices = @transform_3, window_bounds = array<i64: 32, 16>}, {pipeline_mode = #tpu.pipeline_mode<synchronous>, transform_indices = @transform_4, window_bounds = array<i64: 32, 2>}, {transform_indices = @transform_5, window_bounds = array<i64: 2>}, {transform_indices = @transform_6, window_bounds = array<i64: 1, 32, 512>}]} {
    %c0 = arith.constant 0 : index
    %c0_0 = arith.constant 0 : index
    %c0_1 = arith.constant 0 : index
    %0 = vector.load %arg2[%c0, %c0_0, %c0_1] : memref<1x32x512xf32, #tpu.memory_space<vmem>>, vector<1x32x512xf32>
    %1 = vector.shape_cast %0 : vector<1x32x512xf32> to vector<32x512xf32>
    %c0_2 = arith.constant 0 : index
    %c0_3 = arith.constant 0 : index
    %2 = vector.load %arg3[%c0_2, %c0_3] : memref<16x32xbf16, #tpu.memory_space<vmem>>, vector<16x32xbf16>
    %3 = arith.truncf %1 : vector<32x512xf32> to vector<32x512xbf16>
    %cst = arith.constant dense<0.000000e+00> : vector<16x512xf32>
    %4 = tpu.matmul %2, %3, %cst {dimension_numbers = #tpu.dot_dimension_numbers<[1], [0], [0], [1], [0, 0, 1, 1], [], []>} : vector<16x32xbf16>, vector<32x512xbf16>, vector<16x512xf32> -> vector<16x512xf32>
    %c0_4 = arith.constant 0 : index
    %c0_5 = arith.constant 0 : index
    %5 = vector.load %arg4[%c0_4, %c0_5] : memref<16x2xf32, #tpu.memory_space<vmem>>, vector<16x1xf32>
    %6 = vector.broadcast %5 : vector<16x1xf32> to vector<16x512xf32>
    %7 = arith.mulf %4, %6 : vector<16x512xf32>
    %c0_6 = arith.constant 0 : index
    %c1 = arith.constant 1 : index
    %8 = vector.load %arg4[%c0_6, %c1] : memref<16x2xf32, #tpu.memory_space<vmem>>, vector<16x1xf32>
    %9 = vector.broadcast %8 : vector<16x1xf32> to vector<16x512xf32>
    %10 = arith.addf %7, %9 : vector<16x512xf32>
    %cst_7 = arith.constant 0.000000e+00 : f32
    %11 = vector.broadcast %cst_7 : f32 to vector<16x512xf32>
    %12 = arith.cmpf ogt, %10, %11 : vector<16x512xf32>
    %c0_8 = arith.constant 0 : index
    %13 = memref.load %arg7[%c0_8] : memref<2xf32, #tpu.memory_space<smem>>
    %14 = vector.broadcast %13 : f32 to vector<16x512xf32>
    %15 = arith.mulf %14, %10 : vector<16x512xf32>
    %16 = arith.select %12, %10, %15 : vector<16x512xi1>, vector<16x512xf32>
    %c0_9 = arith.constant 0 : index
    %c0_10 = arith.constant 0 : index
    %17 = vector.load %arg5[%c0_9, %c0_10] : memref<32x16xbf16, #tpu.memory_space<vmem>>, vector<32x16xbf16>
    %18 = arith.truncf %16 : vector<16x512xf32> to vector<16x512xbf16>
    %cst_11 = arith.constant dense<0.000000e+00> : vector<32x512xf32>
    %19 = tpu.matmul %17, %18, %cst_11 {dimension_numbers = #tpu.dot_dimension_numbers<[1], [0], [0], [1], [0, 0, 1, 1], [], []>} : vector<32x16xbf16>, vector<16x512xbf16>, vector<32x512xf32> -> vector<32x512xf32>
    %c0_12 = arith.constant 0 : index
    %c0_13 = arith.constant 0 : index
    %20 = vector.load %arg6[%c0_12, %c0_13] : memref<32x2xf32, #tpu.memory_space<vmem>>, vector<32x1xf32>
    %21 = vector.broadcast %20 : vector<32x1xf32> to vector<32x512xf32>
    %22 = arith.mulf %19, %21 : vector<32x512xf32>
    %c0_14 = arith.constant 0 : index
    %c1_15 = arith.constant 1 : index
    %23 = vector.load %arg6[%c0_14, %c1_15] : memref<32x2xf32, #tpu.memory_space<vmem>>, vector<32x1xf32>
    %24 = vector.broadcast %23 : vector<32x1xf32> to vector<32x512xf32>
    %25 = arith.addf %22, %24 : vector<32x512xf32>
    %cst_16 = arith.constant 0.000000e+00 : f32
    %26 = vector.broadcast %cst_16 : f32 to vector<32x512xf32>
    %27 = arith.cmpf ogt, %25, %26 : vector<32x512xf32>
    %c1_17 = arith.constant 1 : index
    %28 = memref.load %arg7[%c1_17] : memref<2xf32, #tpu.memory_space<smem>>
    %29 = vector.broadcast %28 : f32 to vector<32x512xf32>
    %30 = arith.mulf %29, %25 : vector<32x512xf32>
    %31 = arith.select %27, %25, %30 : vector<32x512xi1>, vector<32x512xf32>
    %32 = arith.addf %1, %31 : vector<32x512xf32>
    %c0_18 = arith.constant 0 : index
    %c0_19 = arith.constant 0 : index
    %c0_20 = arith.constant 0 : index
    %33 = vector.load %arg8[%c0_18, %c0_19, %c0_20] : memref<1x32x512xf32, #tpu.memory_space<vmem>>, vector<1x32x512xf32>
    %34 = vector.shape_cast %33 : vector<1x32x512xf32> to vector<32x512xf32>
    %35 = vector.shape_cast %32 : vector<32x512xf32> to vector<1x32x512xf32>
    tpu.vector_store %arg8[%c0_18, %c0_19, %c0_20], %35 {strides = array<i32>} : memref<1x32x512xf32, #tpu.memory_space<vmem>>, vector<1x32x512xf32>,
    return
  }
  func.func @transform_0(%arg0: i32, %arg1: i32) -> (i32, i32, i32) {
    %c0_i32 = arith.constant 0 : i32
    %c0_i32_0 = arith.constant 0 : i32
    return %arg0, %c0_i32, %arg1 : i32, i32, i32
  }
  func.func @transform_1(%arg0: i32, %arg1: i32) -> (i32, i32) {
    %c0_i32 = arith.constant 0 : i32
    %c0_i32_0 = arith.constant 0 : i32
    %c0_i32_1 = arith.constant 0 : i32
    return %c0_i32, %c0_i32_0 : i32, i32
  }
  func.func @transform_2(%arg0: i32, %arg1: i32) -> (i32, i32) {
    %c0_i32 = arith.constant 0 : i32
    %c0_i32_0 = arith.constant 0 : i32
    %c0_i32_1 = arith.constant 0 : i32
    return %c0_i32, %c0_i32_0 : i32, i32
  }
  func.func @transform_3(%arg0: i32, %arg1: i32) -> (i32, i32) {
    %c0_i32 = arith.constant 0 : i32
    %c0_i32_0 = arith.constant 0 : i32
    %c0_i32_1 = arith.constant 0 : i32
    return %c0_i32, %c0_i32_0 : i32, i32
  }
  func.func @transform_4(%arg0: i32, %arg1: i32) -> (i32, i32) {
    %c0_i32 = arith.constant 0 : i32
    %c0_i32_0 = arith.constant 0 : i32
    %c0_i32_1 = arith.constant 0 : i32
    return %c0_i32, %c0_i32_0 : i32, i32
  }
  func.func @transform_5(%arg0: i32, %arg1: i32) -> i32 {
    %c0_i32 = arith.constant 0 : i32
    %c0_i32_0 = arith.constant 0 : i32
    return %c0_i32 : i32
  }
  func.func @transform_6(%arg0: i32, %arg1: i32) -> (i32, i32, i32) {
    %c0_i32 = arith.constant 0 : i32
    %c0_i32_0 = arith.constant 0 : i32
    return %arg0, %c0_i32, %arg1 : i32, i32, i32
  }
}

</mosaic_0001>

<bundles_post_ra>
// kernel: residual_stack_pallas.9
= control target key start
LH: loop header
LB: loop body
LE: loop exit
PB: predicated region body
PF: predicated region fallthrough
CT: control target
= control target key end

     0   :  { %s569_s9 = smov 0   ;;  %s571_s10 = smov 0   ;;  %s708_s0 = inlined_call_operand.vmem [shape: f32[4,32,1024], index: 0, kind: input, shape index: {}]   ;;  %s709_s1 = inlined_call_operand.vmem [shape: bf16[16,32], index: 1, kind: input, shape index: {}]   ;;  %s710_s2 = inlined_call_operand.vmem [shape: f32[16,2], index: 2, kind: output, shape index: {}]  }
   0x1   :  { %s573_s11 = smov 0   ;;  %s575_s12 = smov 0  }
   0x2   :  { %s577_s13 = smov 0   ;;  %s579_s14 = smov 0  }
   0x3   :  { %s581_s15 = smov 0  }
   0x4 LB: > { %s21_s16 = sadd.s32 1, %s542_s13  ;;  %s24_s17 = sadd.s32 1, %s546_s14  ;;  %s550_s15 = sphi %s581_s15, %s12_s15   ;;  %s546_s14 = sphi %s579_s14, %s717_s14   ;;  %s542_s13 = sphi %s577_s13, %s716_s13   ;;  %s538_s12 = sphi %s575_s12, %s715_s12   ;;  %s534_s11 = sphi %s573_s11, %s714_s11   ;;  %s530_s10 = sphi %s571_s10, %s713_s10   ;;  %s526_s9 = sphi %s569_s9, %s712_s9  }
   0x5   : > { %p22_p0 = scmp.ge.s32.totalorder %s21_s16, 2  ;;  %p40_p1 = scmp.ne.s32.totalorder %s530_s10, %s526_s9 }
   0x6   : > { %p41_p2 = scmp.eq.s32.totalorder %s550_s15, 0  ;;  %s33_s21 = sadd.s32 1, %s530_s10 }
   0x7   : > { %s719_s16 = smov (%p22_p0, %s21_s16), 0  ;;  %s721_s17 = smov (!%p22_p0, %s24_s17), %s546_s14 }
   0x8   : > { %p42_p3 = por %p41_p2, %p40_p1  ;;  %p26_p4 = scmp.ge.s32.totalorder %s721_s17, 4 }
   0x9   : > { %s29_s18 = ssub.s32 %s542_s13, %s719_s16  ;;  %p425_p6 = scmp.ge.s32.totalorder %s550_s15, 8 }
   0xa   : > { %s723_s17 = smov (%p26_p4, %s721_s17), 0 }
   0xb   : > { %s28_s19 = ssub.s32 %s546_s14, %s723_s17  ;;  %111 = sbr.rel (%p425_p6) target bundleno = 33 (0x21), region = 20 }
   0xc   : > { %s30_s20 = sor.u32 %s29_s18, %s28_s19 }
   0xd   : > { %p31_p5 = scmp.eq.s32.totalorder %s30_s20, 0 }
   0xf   : > { %s620_s22 = scalar_select %p31_p5, %s530_s10, %s33_s21  }
  0x12   : > { %114 = sbr.rel (!%p42_p3) target bundleno = 33 (0x21), region = 24  ;;  %s116_s23 = sand.u32 (%p42_p3), 1, %s530_s10  }
  0x13   : > { %s427_s24 = sshll.u32 (%p42_p3), %s542_s13, 2  ;;  %s426_s25 = sshll.u32 (%p42_p3), %s116_s23, 7 }
  0x14   : > { %s428_s26 = sshll.u32 (%p42_p3), %s546_s14, 5  ;;  %s118_s4 = scalar_lea.vmem (%p42_p3), [#allocation3], %s426_s25 }
  0x15   : > { %s121_s27 = sadd.s32 (%p42_p3), %s428_s26, %s427_s24 }
  0x16   : > { %s429_s28 = sshll.u32 (%p42_p3), %s121_s27, 3 }
  0x17   : > { %s629_s3 = scalar_lea.vmem (%p42_p3), %s708_s0, %s429_s28 }
  0x18   : > { %v136_v0 = vld [vmem:[%s629_s3] sm:$0xff] (%p42_p3)  ;;  %v138_v1 = vld [vmem:[%s629_s3 + $0x8] sm:$0xff] (%p42_p3)  ;;  %v140_v2 = vld [vmem:[%s629_s3 + $0x10] sm:$0xff] (%p42_p3) }
  0x19   : > { %137 = vst [vmem:[%s118_s4] sm:$0xff] %v136_v0  ;;  %139 = vst [vmem:[%s118_s4 + $0x8] sm:$0xff] %v138_v1  ;;  %v142_v3 = vld [vmem:[%s629_s3 + $0x18] sm:$0xff]  ;;  %v144_v4 = vld [vmem:[%s629_s3 + $0x40] sm:$0xff] }
  0x1a   : > { %141 = vst [vmem:[%s118_s4 + $0x10] sm:$0xff] %v140_v2  ;;  %v146_v5 = vld [vmem:[%s629_s3 + $0x48] sm:$0xff]  ;;  %143 = vst [vmem:[%s118_s4 + $0x18] sm:$0xff] %v142_v3  ;;  %v148_v6 = vld [vmem:[%s629_s3 + $0x50] sm:$0xff] }
  0x1b   : > { %145 = vst [vmem:[%s118_s4 + $0x20] sm:$0xff] %v144_v4  ;;  %147 = vst [vmem:[%s118_s4 + $0x28] sm:$0xff] %v146_v5  ;;  %v150_v7 = vld [vmem:[%s629_s3 + $0x58] sm:$0xff]  ;;  %v152_v8 = vld [vmem:[%s629_s3 + $0x80] sm:$0xff] }
  0x1c   : > { %149 = vst [vmem:[%s118_s4 + $0x30] sm:$0xff] %v148_v6  ;;  %151 = vst [vmem:[%s118_s4 + $0x38] sm:$0xff] %v150_v7  ;;  %v154_v9 = vld [vmem:[%s629_s3 + $0x88] sm:$0xff]  ;;  %v156_v10 = vld [vmem:[%s629_s3 + $0x90] sm:$0xff] }
  0x1d   : > { %153 = vst [vmem:[%s118_s4 + $0x40] sm:$0xff] %v152_v8  ;;  %v158_v11 = vld [vmem:[%s629_s3 + $0x98] sm:$0xff]  ;;  %155 = vst [vmem:[%s118_s4 + $0x48] sm:$0xff] %v154_v9  ;;  %v160_v12 = vld [vmem:[%s629_s3 + $0xc0] sm:$0xff] }
  0x1e   : > { %157 = vst [vmem:[%s118_s4 + $0x50] sm:$0xff] %v156_v10  ;;  %159 = vst [vmem:[%s118_s4 + $0x58] sm:$0xff] %v158_v11  ;;  %v162_v13 = vld [vmem:[%s629_s3 + $0xc8] sm:$0xff]  ;;  %v164_v14 = vld [vmem:[%s629_s3 + $0xd0] sm:$0xff] }
  0x1f   : > { %161 = vst [vmem:[%s118_s4 + $0x60] sm:$0xff] %v160_v12  ;;  %163 = vst [vmem:[%s118_s4 + $0x68] sm:$0xff] %v162_v13  ;;  %v166_v15 = vld [vmem:[%s629_s3 + $0xd8] sm:$0xff] }
  0x20   : > { %165 = vst [vmem:[%s118_s4 + $0x70] sm:$0xff] %v164_v14  ;;  %167 = vst [vmem:[%s118_s4 + $0x78] sm:$0xff] %v166_v15 }
  0x21 PF: > { %p430_p7 = scmp.ge.s32.totalorder %s550_s15, 1  ;;  %p172_p8 = scmp.lt.s32.totalorder %s550_s15, 9 }
  0x23   : > { %p173_p9 = pnand %p430_p7, %p172_p8 }
  0x24   : > { %s179_s5 = sand.u32 (!%p173_p9), 1, %s526_s9   ;;  %p197_p10 = scmp.eq.s32.totalorder (!%p173_p9), %s538_s12, 0 }
  0x25   : > { %176 = sbr.rel (%p173_p9) target bundleno = 442 (0x1ba), region = 47  ;;  %s431_s6 = sshll.u32 (!%p173_p9), %s179_s5, 7 }
  0x26   : > { %p198_p11 = scmp.eq.s32.totalorder (!%p173_p9), %s534_s11, 0  ;;  %s652_s7 = scalar_lea.vmem (!%p173_p9), [#allocation3], %s431_s6 }
  0x28   : > { %p199_p12 = pnand (!%p173_p9), %p198_p11, %p197_p10 }
  0x2c   : > { %202 = sbr.rel (%p199_p12) target bundleno = 51 (0x33), region = 55  ;;  %vm203_vm0 = vcmask (!%p199_p12), 15360   ;;  %v552_v16 = vmov (!%p199_p12), 0.0  }
  0x2d   : > { %204 = vst.msk [vmem:[#allocation2] sm:$0xff] (!%p199_p12), %vm203_vm0, %v552_v16  ;;  %205 = vst.msk [vmem:[#allocation2 + $0x8] sm:$0xff] (!%p199_p12), %vm203_vm0, %v552_v16 }
  0x33 PF: > { %v207_v17 = vld [vmem:[%s652_s7 + $0x8] sm:$0xff]  ;;  %v209_v19 = vld [vmem:[%s652_s7 + $0x18] sm:$0xff]  ;;  %v206_v22 = vld [vmem:[%s652_s7] sm:$0xff]  ;;  %v553_v24 = vmov 0   ;;  %vm237_vm1 = vcmask 261120   ;;  %p365_p13 = scmp.eq.s32.totalorder %s538_s12, 3 }
  0x34   : > { %v211_v18 = vld [vmem:[%s652_s7 + $0x28] sm:$0xff]  ;;  %v213_v21 = vld [vmem:[%s652_s7 + $0x38] sm:$0xff]  ;;  %v210_v23 = vld [vmem:[%s652_s7 + $0x20] sm:$0xff]  ;;  %273 = vmatprep.mubr.bf16.mxu0 %v553_v24  ;;  %316 = vmatprep.mubr.bf16.mxu1 %v553_v24  ;;  %p366_p0 = scmp.eq.s32.totalorder %s534_s11, 1  ;;  %vm357_vm2 = vcmask 7168   ;;  %vm362_vm3 = vcmask 15360  }
  0x35   : > { %v225_v20 = vpack.c.bf16 %v211_v18, %v207_v17  ;;  %v227_v25 = vpack.c.bf16 %v213_v21, %v209_v19  ;;  %v224_v26 = vpack.c.bf16 %v210_v23, %v206_v22  ;;  %v208_v27 = vld [vmem:[%s652_s7 + $0x10] sm:$0xff]  ;;  %v215_v29 = vld [vmem:[%s652_s7 + $0x48] sm:$0xff]  ;;  %v217_v32 = vld [vmem:[%s652_s7 + $0x58] sm:$0xff] }
  0x36   : > { %v212_v28 = vld [vmem:[%s652_s7 + $0x30] sm:$0xff]  ;;  %v219_v31 = vld [vmem:[%s652_s7 + $0x68] sm:$0xff]  ;;  %v221_v33 = vld [vmem:[%s652_s7 + $0x78] sm:$0xff]  ;;  %p675_p1 = pnand %p366_p0, %p365_p13 }
  0x37   : > { %241 = vmatprep.subr.bf16.mxu0 %v225_v20  ;;  %v226_v30 = vpack.c.bf16 %v212_v28, %v208_v27  ;;  %284 = vmatprep.subr.bf16.mxu1 %v227_v25  ;;  %v229_v34 = vpack.c.bf16 %v219_v31, %v215_v29  ;;  %v231_v35 = vpack.c.bf16 %v221_v33, %v217_v32  ;;  %v214_v36 = vld [vmem:[%s652_s7 + $0x40] sm:$0xff]  ;;  %v216_v38 = vld [vmem:[%s652_s7 + $0x50] sm:$0xff]  ;;  %v356_v12 = vld [vmem:[#allocation2 + $0x8] sm:$0xff] }
  0x38   : > { %242 = vmatpush1.bf16.msra.mxu0 %v224_v26  ;;  %v218_v37 = vld [vmem:[%s652_s7 + $0x60] sm:$0xff]  ;;  %v220_v40 = vld [vmem:[%s652_s7 + $0x70] sm:$0xff] }
  0x39   : > { %285 = vmatpush1.bf16.msra.mxu1 %v226_v30  ;;  %v228_v39 = vpack.c.bf16 %v218_v37, %v214_v36  ;;  %243 = vmatprep.subr.bf16.mxu0 %v229_v34  ;;  %v230_v41 = vpack.c.bf16 %v220_v40, %v216_v38  ;;  %v495_v42 = vld [vmem:[%s709_s1] sm:$0xff]  }
  0x3a   : > { %286 = vmatprep.subr.bf16.mxu1 %v231_v35  ;;  %v355_v8 = vld [vmem:[#allocation2] sm:$0xff] }
  0x3c   : > { %244 = vmatpush1.bf16.msra.mxu0 %v228_v39 }
  0x3d   : > { %287 = vmatpush1.bf16.msra.mxu1 %v230_v41 }
  0x3f   : > { %433 = vmatmul.mubr.msk.bf16.vlgmr.msra.gmra.mrb[0].mxu0 %vm237_vm1, %v495_v42 }
  0x40   : > { %434 = vmatmul.mubr.msk.bf16.vlgmr.msra.gmra.mrb[0].mxu1 %vm237_vm1, %v495_v42 }
 0x112   : > { %v275_v43 = vpop.f32.mrb[0].mxu0 }
 0x113   : > { %v337_v44 = vmul.f32 %v275_v43, %v275_v43  ;;  %v318_v45 = vpop.f32.mrb[0].mxu1  ;;  %v277_v46 = vpop.f32.mrb[1].mxu0 }
 0x114   : > { %v339_v47 = vmul.f32 %v318_v45, %v318_v45  ;;  %v327_v48 = vadd.f32 %v277_v46, %v275_v43  ;;  %v338_v49 = vmul.f32 %v277_v46, %v277_v46  ;;  %v320_v50 = vpop.f32.mrb[1].mxu1  ;;  %v279_v51 = vpop.f32.mrb[2].mxu0 }
 0x115   : > { %v341_v52 = vmul.f32 %v279_v51, %v279_v51  ;;  %v322_v53 = vpop.f32.mrb[2].mxu1  ;;  %v281_v54 = vpop.f32.mrb[3].mxu0  ;;  %v340_v59 = vmul.f32 %v320_v50, %v320_v50 }
 0x116   : > { %v345_v55 = vadd.f32 %v338_v49, %v337_v44  ;;  %v332_v56 = vadd.f32 %v281_v54, %v279_v51  ;;  %v342_v57 = vmul.f32 %v281_v54, %v281_v54  ;;  %v324_v58 = vpop.f32.mrb[3].mxu1  ;;  %v328_v60 = vadd.f32 %v327_v48, %v318_v45 }
 0x117   : > { %v343_v61 = vmul.f32 %v322_v53, %v322_v53  ;;  %v344_v3 = vmul.f32 %v324_v58, %v324_v58 }
 0x118   : > { %v350_v62 = vadd.f32 %v342_v57, %v341_v52  ;;  %v333_v63 = vadd.f32 %v332_v56, %v322_v53  ;;  %v346_v0 = vadd.f32 %v345_v55, %v339_v47  ;;  %v329_v1 = vadd.f32 %v328_v60, %v320_v50 }
 0x11a   : > { %v334_v2 = vadd.f32 %v333_v63, %v324_v58  ;;  %v347_v4 = vadd.f32 %v346_v0, %v340_v59  ;;  %v351_v5 = vadd.f32 %v350_v62, %v343_v61  ;;  %330 = vadd.xlane.f32.xlu0 %v329_v1 }
 0x11c   : > { %348 = vadd.xlane.f32.xlu1 %v347_v4  ;;  %v352_v6 = vadd.f32 %v351_v5, %v344_v3 }
 0x11e   : > { %335 = vadd.xlane.f32.xlu0 %v334_v2 }
 0x120   : > { %353 = vadd.xlane.f32.xlu1 %v352_v6 }
 0x1a7   : > { %v331_v7 = vpop.xlane.xlu0 %330 }
 0x1a9   : > { %v349_v9 = vpop.xlane.xlu1 %348 }
 0x1aa   : > { %v358_v10 = vsel %vm357_vm2, %v331_v7, %v349_v9 }
 0x1ab   : > { %v360_v11 = vadd.f32 %v358_v10, %v355_v8  ;;  %v336_v13 = vpop.xlane.xlu0 %335  ;;  %370 = sbr.rel (%p675_p1) target bundleno = 442 (0x1ba), region = 59 }
 0x1ad   : > { %363 = vst.msk [vmem:[#allocation2] sm:$0xff] %vm362_vm3, %v360_v11  ;;  %v354_v14 = vpop.xlane.xlu1 %353 }
 0x1ae   : > { %v359_v15 = vsel %vm357_vm2, %v336_v13, %v354_v14 }
 0x1af   : > { %v361_v16 = vadd.f32 %v359_v15, %v356_v12 }
 0x1b1   : > { %364 = vst.msk [vmem:[#allocation2 + $0x8] sm:$0xff] %vm362_vm3, %v361_v16 }
 0x1b4   : > { %v371_v17 = vld [vmem:[#allocation2] sm:$0xff] }
 0x1b5   : > { %373 = vst.msk [vmem:[%s710_s2] sm:$0xff] %vm362_vm3, %v371_v17 }
 0x1b8   : > { %v372_v18 = vld [vmem:[#allocation2 + $0x8] sm:$0xff] }
 0x1b9   : > { %374 = vst.msk [vmem:[%s710_s2 + $0x8] sm:$0xff] %vm362_vm3, %v372_v18 }
 0x1ba PF: > { %s12_s15 = sadd.s32 1, %s550_s15   ;;  %s712_s9 = smov %s530_s10 }
 0x1bb   : > { %p9_p2 = scmp.ge.s32.totalorder %s12_s15, 10   ;;  %s713_s10 = smov %s620_s22 }
 0x1bc   : > { %s714_s11 = smov %s542_s13  ;;  %s715_s12 = smov %s546_s14 }
 0x1bd   : > { %s716_s13 = smov %s719_s16  ;;  %s717_s14 = smov %s723_s17 }
 0x1be   :  { %11 = sbr.rel (!%p9_p2) target bundleno = 4 (0x4), region = 90 }

// kernel: residual_stack_pallas.10
= control target key start
LH: loop header
LB: loop body
LE: loop exit
PB: predicated region body
PF: predicated region fallthrough
CT: control target
= control target key end

     0   :  { %10 = vsyncpa [#allocation5], 0  ;;  %s973_s18 = smov 0   ;;  %s975_s19 = smov 0   ;;  %s1177_s0 = inlined_call_operand.vmem [shape: f32[4,32,1024], index: 0, kind: input, shape index: {}]   ;;  %s1178_s1 = inlined_call_operand.vmem [shape: bf16[16,32], index: 1, kind: input, shape index: {}]   ;;  %s1179_s2 = inlined_call_operand.vmem [shape: f32[16,2], index: 2, kind: input, shape index: {}]   ;;  %s1180_s3 = inlined_call_operand.vmem [shape: bf16[32,16], index: 3, kind: input, shape index: {}]   ;;  %s1181_s4 = inlined_call_operand.vmem [shape: f32[2], index: 4, kind: input, shape index: {}]   ;;  %s1182_s5 = inlined_call_operand.vmem [shape: f32[32,2], index: 5, kind: output, shape index: {}]  }
   0x1   :  { %s977_s20 = smov 0   ;;  %s979_s21 = smov 0  }
   0x2   :  { %s981_s22 = smov 0   ;;  %s983_s23 = smov 0  }
   0x3   :  { %s985_s24 = smov 0  }
   0x4 LB: > { %s766_s25 = sadd.s32 4294967295, %s937_s24   ;;  %s25_s26 = sadd.s32 1, %s929_s22  ;;  %s937_s24 = sphi %s985_s24, %s16_s24   ;;  %s933_s23 = sphi %s983_s23, %s1194_s23   ;;  %s929_s22 = sphi %s981_s22, %s1193_s22   ;;  %s925_s21 = sphi %s979_s21, %s1192_s21   ;;  %s921_s20 = sphi %s977_s20, %s1191_s20   ;;  %s917_s19 = sphi %s975_s19, %s1190_s19   ;;  %s913_s18 = sphi %s973_s18, %s1189_s18  }
   0x5   : > { %p26_p0 = scmp.ge.s32.totalorder %s25_s26, 2  ;;  %s28_s27 = sadd.s32 1, %s933_s23 }
   0x6   : > { %s37_s28 = sadd.s32 1, %s917_s19  ;;  %p44_p1 = scmp.ne.s32.totalorder %s917_s19, %s913_s18 }
   0x7   : > { %s1196_s26 = smov (%p26_p0, %s25_s26), 0  ;;  %s1198_s27 = smov (!%p26_p0, %s28_s27), %s933_s23 }
   0x8   : > { %s33_s29 = ssub.s32 %s929_s22, %s1196_s26  ;;  %p45_p2 = scmp.eq.s32.totalorder %s937_s24, 0 }
   0x9   : > { %p30_p3 = scmp.ge.s32.totalorder %s1198_s27, 4  ;;  %p767_p4 = scmp.ge.s32.totalorder %s937_s24, 1 }
   0xa   : > { %p1021_p5 = por %p45_p2, %p44_p1  ;;  %p166_p6 = scmp.lt.s32.totalorder %s937_s24, 9 }
   0xb   : > { %s1200_s27 = smov (%p30_p3, %s1198_s27), 0  ;;  %p1034_p8 = scmp.eq.s32.totalorder %s766_s25, 0 }
   0xc   : > { %p1028_p7 = pnand %p767_p4, %p166_p6  ;;  %s32_s7 = ssub.s32 %s933_s23, %s1200_s27 }
   0xd   : > { %s34_s9 = sor.u32 %s33_s29, %s32_s7  ;;  %s188_s12 = sshll.u32 %s1181_s4, 4  ;;  %s189_s12 = int_to_ptr.vmem [resolvable:$true] %s188_s12 }
   0xe   : > { %s1185_s6 = scalar_select %p1028_p7, 1, 0 }
   0xf   : > { %p792_p9 = pneg %p1028_p7  ;;  %p35_p10 = scmp.eq.s32.totalorder %s34_s9, 0 }
  0x10   : > { %s864_s14 = scalar_lea.vmem %s189_s12, 16  ;;  %p872_p2 = scmp.lt.s32.totalorder %s189_s12, %s189_s12 }
  0x11   : > { %p793_p11 = pnand %p1034_p8, %p792_p9  ;;  %p865_p12 = scmp.ne.s32.totalorder %s189_s12, %s864_s14 }
  0x12   : > { %s1046_s13 = scalar_select %p35_p10, %s917_s19, %s37_s28  }
  0x13   : > { %p866_p13 = pneg %p793_p11  ;;  %p873_p3 = scmp.lt.s32.totalorder %s864_s14, %s864_s14 }
  0x15   : > { %p867_p0 = pnand %p866_p13, %p865_p12  ;;  %p874_p4 = por %p873_p3, %p872_p2 }
  0x17   : > { %p868_p1 = pneg %p867_p0 }
  0x19   : > { %p875_p6 = pnand %p874_p4, %p868_p1 }
  0x1b   : > { %878 = shalt.err (!%p875_p6)
}
  0x1c   : > { %s939_s15 = smov [#allocation4]   ;;  %p769_p7 = scmp.ge.s32.totalorder %s937_s24, 8 }
  0x1d   : > { %795 = dma.vmem_to_smem (!%p793_p11), %s189_s12, 16, %s939_s15, [#allocation5]  }
  0x1e   : > { %195 = sbr.rel (%p769_p7) target bundleno = 52 (0x34), region = 32 }
  0x25   : > { %198 = sbr.rel (!%p1021_p5) target bundleno = 52 (0x34), region = 36  ;;  %s200_s16 = sand.u32 (%p1021_p5), 1, %s917_s19  }
  0x26   : > { %s771_s17 = sshll.u32 (%p1021_p5), %s929_s22, 2  ;;  %s770_s25 = sshll.u32 (%p1021_p5), %s200_s16, 7 }
  0x27   : > { %s772_s28 = sshll.u32 (%p1021_p5), %s933_s23, 5  ;;  %s202_s30 = scalar_lea.vmem (%p1021_p5), [#allocation3], %s770_s25 }
  0x28   : > { %s205_s29 = sadd.s32 (%p1021_p5), %s772_s28, %s771_s17 }
  0x29   : > { %s773_s7 = sshll.u32 (%p1021_p5), %s205_s29, 3 }
  0x2a   : > { %s1057_s11 = scalar_lea.vmem (%p1021_p5), %s1177_s0, %s773_s7 }
  0x2b   : > { %v220_v0 = vld [vmem:[%s1057_s11] sm:$0xff] (%p1021_p5)  ;;  %v222_v1 = vld [vmem:[%s1057_s11 + $0x8] sm:$0xff] (%p1021_p5)  ;;  %v224_v2 = vld [vmem:[%s1057_s11 + $0x10] sm:$0xff] (%p1021_p5) }
  0x2c   : > { %221 = vst [vmem:[%s202_s30] sm:$0xff] %v220_v0  ;;  %223 = vst [vmem:[%s202_s30 + $0x8] sm:$0xff] %v222_v1  ;;  %v226_v3 = vld [vmem:[%s1057_s11 + $0x18] sm:$0xff]  ;;  %v228_v4 = vld [vmem:[%s1057_s11 + $0x40] sm:$0xff] }
  0x2d   : > { %225 = vst [vmem:[%s202_s30 + $0x10] sm:$0xff] %v224_v2  ;;  %v230_v5 = vld [vmem:[%s1057_s11 + $0x48] sm:$0xff]  ;;  %227 = vst [vmem:[%s202_s30 + $0x18] sm:$0xff] %v226_v3  ;;  %v232_v6 = vld [vmem:[%s1057_s11 + $0x50] sm:$0xff] }
  0x2e   : > { %229 = vst [vmem:[%s202_s30 + $0x20] sm:$0xff] %v228_v4  ;;  %231 = vst [vmem:[%s202_s30 + $0x28] sm:$0xff] %v230_v5  ;;  %v234_v7 = vld [vmem:[%s1057_s11 + $0x58] sm:$0xff]  ;;  %v236_v8 = vld [vmem:[%s1057_s11 + $0x80] sm:$0xff] }
  0x2f   : > { %233 = vst [vmem:[%s202_s30 + $0x30] sm:$0xff] %v232_v6  ;;  %235 = vst [vmem:[%s202_s30 + $0x38] sm:$0xff] %v234_v7  ;;  %v238_v9 = vld [vmem:[%s1057_s11 + $0x88] sm:$0xff]  ;;  %v240_v10 = vld [vmem:[%s1057_s11 + $0x90] sm:$0xff] }
  0x30   : > { %237 = vst [vmem:[%s202_s30 + $0x40] sm:$0xff] %v236_v8  ;;  %v242_v11 = vld [vmem:[%s1057_s11 + $0x98] sm:$0xff]  ;;  %239 = vst [vmem:[%s202_s30 + $0x48] sm:$0xff] %v238_v9  ;;  %v244_v12 = vld [vmem:[%s1057_s11 + $0xc0] sm:$0xff] }
  0x31   : > { %241 = vst [vmem:[%s202_s30 + $0x50] sm:$0xff] %v240_v10  ;;  %243 = vst [vmem:[%s202_s30 + $0x58] sm:$0xff] %v242_v11  ;;  %v246_v13 = vld [vmem:[%s1057_s11 + $0xc8] sm:$0xff]  ;;  %v248_v14 = vld [vmem:[%s1057_s11 + $0xd0] sm:$0xff] }
  0x32   : > { %245 = vst [vmem:[%s202_s30 + $0x60] sm:$0xff] %v244_v12  ;;  %247 = vst [vmem:[%s202_s30 + $0x68] sm:$0xff] %v246_v13  ;;  %v250_v15 = vld [vmem:[%s1057_s11 + $0xd8] sm:$0xff] }
  0x33   : > { %249 = vst [vmem:[%s202_s30 + $0x70] sm:$0xff] %v248_v14  ;;  %251 = vst [vmem:[%s202_s30 + $0x78] sm:$0xff] %v250_v15 }
  0x34 PF: > { %p1187_p5 = scmp.ne.s32.totalorder %s1185_s6, 0 }
  0x35   : > { %s263_s12 = sand.u32 (!%p1187_p5), 1, %s913_s18  }
  0x36   : > { %260 = sbr.rel (%p1187_p5) target bundleno = 706 (0x2c2), region = 59  ;;  %s775_s14 = sshll.u32 (!%p1187_p5), %s263_s12, 7 }
  0x37   : > { %s1078_s15 = scalar_lea.vmem (!%p1187_p5), [#allocation3], %s775_s14 }
  0x3d   : > { %908 = dma.done.wait (%p1034_p8), [#allocation5], 16  }
  0x3e   : > { %910 = vsyncadd (%p1034_p8), [#allocation5], 4294967280 }
  0x3f   : > { %273 = sfence }
  0x40   : > { %p292_p7 = scmp.eq.s32.totalorder %s925_s21, 0  ;;  %p293_p9 = scmp.eq.s32.totalorder %s921_s20, 0 }
  0x42   : > { %p294_p10 = pnand %p293_p9, %p292_p7 }
  0x43   : > { %vm298_vm0 = vcmask (!%p294_p10), 15360   ;;  %v940_v16 = vmov (!%p294_p10), 0.0  }
  0x44   : > { %297 = sbr.rel (%p294_p10) target bundleno = 75 (0x4b), region = 71  ;;  %299 = vst.msk [vmem:[#allocation2] sm:$0xff] (!%p294_p10), %vm298_vm0, %v940_v16  ;;  %300 = vst.msk [vmem:[#allocation2 + $0x8] sm:$0xff] (!%p294_p10), %vm298_vm0, %v940_v16 }
  0x45   : > { %301 = vst.msk [vmem:[#allocation2 + $0x10] sm:$0xff] (!%p294_p10), %vm298_vm0, %v940_v16  ;;  %302 = vst.msk [vmem:[#allocation2 + $0x18] sm:$0xff] (!%p294_p10), %vm298_vm0, %v940_v16 }
  0x4b PF: > { %v304_v17 = vld [vmem:[%s1078_s15 + $0x8] sm:$0xff]  ;;  %v306_v19 = vld [vmem:[%s1078_s15 + $0x18] sm:$0xff]  ;;  %v303_v22 = vld [vmem:[%s1078_s15] sm:$0xff]  ;;  %v941_v24 = vmov 0   ;;  %v942_v30 = vmov 1   ;;  %vm334_vm1 = vcmask 261120  }
  0x4c   : > { %v308_v18 = vld [vmem:[%s1078_s15 + $0x28] sm:$0xff]  ;;  %v310_v21 = vld [vmem:[%s1078_s15 + $0x38] sm:$0xff]  ;;  %v307_v23 = vld [vmem:[%s1078_s15 + $0x20] sm:$0xff]  ;;  %370 = vmatprep.mubr.bf16.mxu0 %v941_v24  ;;  %413 = vmatprep.mubr.bf16.mxu1 %v941_v24  ;;  %s460_s28 = sld [smem:[#allocation4]]  ;;  %vm504_vm10 = vcmask 130048   ;;  %p691_p8 = scmp.eq.s32.totalorder %s925_s21, 3 }
  0x4d   : > { %v322_v20 = vpack.c.bf16 %v308_v18, %v304_v17  ;;  %v324_v25 = vpack.c.bf16 %v310_v21, %v306_v19  ;;  %v321_v26 = vpack.c.bf16 %v307_v23, %v303_v22  ;;  %v305_v27 = vld [vmem:[%s1078_s15 + $0x10] sm:$0xff]  ;;  %v312_v29 = vld [vmem:[%s1078_s15 + $0x48] sm:$0xff]  ;;  %858 = vset.pattern.permute.xlu0 %v941_v24  ;;  %859 = vset.pattern.permute.xlu1 %v942_v30  ;;  %v314_v33 = vld [vmem:[%s1078_s15 + $0x58] sm:$0xff]  ;;  %p692_p11 = scmp.eq.s32.totalorder %s921_s20, 1  ;;  %vm677_vm11 = vcmask 7168  }
  0x4e   : > { %v309_v28 = vld [vmem:[%s1078_s15 + $0x30] sm:$0xff]  ;;  %v316_v32 = vld [vmem:[%s1078_s15 + $0x68] sm:$0xff]  ;;  %v318_v34 = vld [vmem:[%s1078_s15 + $0x78] sm:$0xff]  ;;  %vm686_vm12 = vcmask 15360  }
  0x4f   : > { %338 = vmatprep.subr.bf16.mxu0 %v322_v20  ;;  %v323_v31 = vpack.c.bf16 %v309_v28, %v305_v27  ;;  %381 = vmatprep.subr.bf16.mxu1 %v324_v25  ;;  %v326_v35 = vpack.c.bf16 %v316_v32, %v312_v29  ;;  %v328_v36 = vpack.c.bf16 %v318_v34, %v314_v33  ;;  %v311_v37 = vld [vmem:[%s1078_s15 + $0x40] sm:$0xff]  ;;  %v313_v39 = vld [vmem:[%s1078_s15 + $0x50] sm:$0xff]  ;;  %v425_v45 = vld [vmem:[%s1179_s2 + $0x8] sm:$0xff]  ;;  %p1126_p12 = pnand %p692_p11, %p691_p8 }
  0x50   : > { %339 = vmatpush1.bf16.msra.mxu0 %v321_v26  ;;  %v315_v38 = vld [vmem:[%s1078_s15 + $0x60] sm:$0xff]  ;;  %v317_v41 = vld [vmem:[%s1078_s15 + $0x70] sm:$0xff]  ;;  %v863_v33 = vld [vmem:[%s1180_s3 + $0x8] sm:$0xff]  }
  0x51   : > { %382 = vmatpush1.bf16.msra.mxu1 %v323_v31  ;;  %v325_v40 = vpack.c.bf16 %v315_v38, %v311_v37  ;;  %340 = vmatprep.subr.bf16.mxu0 %v326_v35  ;;  %v327_v42 = vpack.c.bf16 %v317_v41, %v313_v39  ;;  %v861_v43 = vld [vmem:[%s1178_s1] sm:$0xff]  }
  0x52   : > { %383 = vmatprep.subr.bf16.mxu1 %v328_v36  ;;  %v424_v44 = vld [vmem:[%s1179_s2] sm:$0xff]  ;;  %v469_v53 = vstv %s460_s28 }
  0x53   : > { %428 = vperm.xlu0 %858, %v424_v44   ;;  %445 = vperm.xlu1 %859, %v424_v44   ;;  %v862_v32 = vld [vmem:[%s1180_s3] sm:$0xff]  }
  0x54   : > { %341 = vmatpush1.bf16.msra.mxu0 %v325_v40 }
  0x55   : > { %384 = vmatpush1.bf16.msra.mxu1 %v327_v42 }
  0x57   : > { %778 = vmatmul.mubr.msk.bf16.vlgmr.msra.gmra.mrb[0].mxu0 %vm334_vm1, %v861_v43  ;;  %433 = vperm.xlu0 %858, %v425_v45  }
  0x58   : > { %779 = vmatmul.mubr.msk.bf16.vlgmr.msra.gmra.mrb[0].mxu1 %vm334_vm1, %v861_v43  ;;  %449 = vperm.xlu1 %859, %v425_v45  }
  0x59   : > { %543 = vmatprep.mubr.bf16.mxu0 %v941_v24  ;;  %596 = vmatprep.mubr.bf16.mxu1 %v941_v24 }
  0x5b   : > { %860 = vset.pattern.permute.xlu0 %v942_v30 }
  0xd2   : > { %v429_v46 = vpop.permute.xlu0 %428  ;;  %v446_v47 = vpop.permute.xlu1 %445 }
  0xd6   : > { %v434_v48 = vpop.permute.xlu0 %433 }
  0xd7   : > { %v450_v0 = vpop.permute.xlu1 %449 }
 0x12a   : > { %v372_v49 = vpop.f32.mrb[0].mxu0 }
 0x12b   : > { %v436_v50 = vmul.f32 %v429_v46, %v372_v49  ;;  %v415_v51 = vpop.f32.mrb[0].mxu1  ;;  %v374_v52 = vpop.f32.mrb[1].mxu0 }
 0x12c   : > { %v438_v54 = vmul.f32 %v429_v46, %v415_v51  ;;  %v437_v55 = vmul.f32 %v429_v46, %v374_v52  ;;  %v417_v56 = vpop.f32.mrb[1].mxu1  ;;  %v376_v57 = vpop.f32.mrb[2].mxu0 }
 0x12d   : > { %v452_v58 = vadd.f32 %v446_v47, %v436_v50  ;;  %v439_v59 = vmul.f32 %v429_v46, %v417_v56  ;;  %v440_v60 = vmul.f32 %v434_v48, %v376_v57  ;;  %v419_v61 = vpop.f32.mrb[2].mxu1  ;;  %v378_v62 = vpop.f32.mrb[3].mxu0 }
 0x12e   : > { %v454_v63 = vadd.f32 %v446_v47, %v438_v54  ;;  %v453_v1 = vadd.f32 %v446_v47, %v437_v55  ;;  %v442_v2 = vmul.f32 %v434_v48, %v419_v61  ;;  %v441_v3 = vmul.f32 %v434_v48, %v378_v62  ;;  %v421_v4 = vpop.f32.mrb[3].mxu1 }
 0x12f   : > { %v470_v5 = vmul.f32 %v469_v53, %v452_v58  ;;  %v456_v6 = vadd.f32 %v450_v0, %v440_v60  ;;  %vm461_vm2 = vcmp.gt.f32.partialorder %v452_v58, 0.0  ;;  %v455_v8 = vadd.f32 %v446_v47, %v439_v59 }
 0x130   : > { %v472_v7 = vmul.f32 %v469_v53, %v454_v63  ;;  %v471_v9 = vmul.f32 %v469_v53, %v453_v1  ;;  %v458_v11 = vadd.f32 %v450_v0, %v442_v2  ;;  %v457_v12 = vadd.f32 %v450_v0, %v441_v3 }
 0x131   : > { %vm465_vm3 = vcmp.gt.f32.partialorder %v456_v6, 0.0  ;;  %v474_v10 = vmul.f32 %v469_v53, %v456_v6  ;;  %v478_v13 = vsel %vm461_vm2, %v452_v58, %v470_v5  ;;  %vm463_vm4 = vcmp.gt.f32.partialorder %v454_v63, 0.0 }
 0x132   : > { %vm462_vm5 = vcmp.gt.f32.partialorder %v453_v1, 0.0  ;;  %v443_v14 = vmul.f32 %v434_v48, %v421_v4  ;;  %vm467_vm6 = vcmp.gt.f32.partialorder %v458_v11, 0.0  ;;  %v476_v16 = vmul.f32 %v469_v53, %v458_v11 }
 0x133   : > { %v482_v15 = vsel %vm465_vm3, %v456_v6, %v474_v10  ;;  %vm466_vm7 = vcmp.gt.f32.partialorder %v457_v12, 0.0  ;;  %v473_v17 = vmul.f32 %v469_v53, %v455_v8  ;;  %v475_v18 = vmul.f32 %v469_v53, %v457_v12 }
 0x134   : > { %v459_v19 = vadd.f32 %v450_v0, %v443_v14  ;;  %v490_v20 = vpack.c.bf16 %v482_v15, %v478_v13  ;;  %v480_v21 = vsel %vm463_vm4, %v454_v63, %v472_v7  ;;  %vm464_vm8 = vcmp.gt.f32.partialorder %v455_v8, 0.0 }
 0x135   : > { %v484_v22 = vsel %vm467_vm6, %v458_v11, %v476_v16  ;;  %v479_v23 = vsel %vm462_vm5, %v453_v1, %v471_v9  ;;  %v483_v26 = vsel %vm466_vm7, %v457_v12, %v475_v18  ;;  %v481_v29 = vsel %vm464_vm8, %v455_v8, %v473_v17 }
 0x136   : > { %vm468_vm9 = vcmp.gt.f32.partialorder %v459_v19, 0.0  ;;  %v477_v25 = vmul.f32 %v469_v53, %v459_v19  ;;  %v492_v27 = vpack.c.bf16 %v484_v22, %v480_v21  ;;  %v491_v28 = vpack.c.bf16 %v483_v26, %v479_v23 }
 0x138   : > { %v485_v30 = vsel %vm468_vm9, %v459_v19, %v477_v25  ;;  %511 = vmatprep.subr.bf16.mxu0 %v491_v28  ;;  %v674_v28 = vld [vmem:[#allocation2 + $0x8] sm:$0xff] }
 0x139   : > { %v493_v31 = vpack.c.bf16 %v485_v30, %v481_v29  ;;  %512 = vmatpush1.bf16.msra.mxu0 %v490_v20 }
 0x13b   : > { %564 = vmatprep.subr.bf16.mxu1 %v493_v31  ;;  %v673_v31 = vld [vmem:[#allocation2] sm:$0xff] }
 0x13c   : > { %565 = vmatpush1.bf16.msra.mxu1 %v492_v27  ;;  %782 = vmatmul.mubr.msk.bf16.vlgmr.msra.gmra.mrb[4].mxu0 %vm504_vm10, %v862_v32 }
 0x13d   : > { %553 = vmatprep.mubr.bf16.mxu0 %v941_v24 }
 0x13f   : > { %784 = vmatmul.mubr.msk.bf16.vlgmr.msra.gmra.mrb[4].mxu1 %vm504_vm10, %v862_v32 }
 0x140   : > { %606 = vmatprep.mubr.bf16.mxu1 %v941_v24 }
 0x144   : > { %783 = vmatmul.mubr.msk.bf16.gmra.mrb[8].mxu0 %vm504_vm10, %v863_v33 }
 0x147   : > { %785 = vmatmul.mubr.msk.bf16.gmra.mrb[8].mxu1 %vm504_vm10, %v863_v33 }
 0x20f   : > { %v545_v34 = vpop.f32.mrb[4].mxu0 }
 0x210   : > { %v637_v35 = vmul.f32 %v545_v34, %v545_v34  ;;  %v547_v36 = vpop.f32.mrb[5].mxu0 }
 0x211   : > { %v617_v37 = vadd.f32 %v547_v36, %v545_v34  ;;  %v638_v38 = vmul.f32 %v547_v36, %v547_v36  ;;  %v549_v39 = vpop.f32.mrb[6].mxu0 }
 0x212   : > { %v598_v40 = vpop.f32.mrb[4].mxu1  ;;  %v641_v41 = vmul.f32 %v549_v39, %v549_v39  ;;  %v551_v42 = vpop.f32.mrb[7].mxu0 }
 0x213   : > { %v639_v43 = vmul.f32 %v598_v40, %v598_v40  ;;  %v600_v44 = vpop.f32.mrb[5].mxu1  ;;  %v653_v45 = vadd.f32 %v638_v38, %v637_v35  ;;  %v622_v46 = vadd.f32 %v551_v42, %v549_v39  ;;  %v642_v24 = vmul.f32 %v551_v42, %v551_v42  ;;  %v676_v42 = vld [vmem:[#allocation2 + $0x18] sm:$0xff] }
 0x214   : > { %v618_v47 = vadd.f32 %v617_v37, %v598_v40  ;;  %v602_v48 = vpop.f32.mrb[6].mxu1  ;;  %v640_v54 = vmul.f32 %v600_v44, %v600_v44  ;;  %v675_v37 = vld [vmem:[#allocation2 + $0x10] sm:$0xff] }
 0x215   : > { %v604_v49 = vpop.f32.mrb[7].mxu1  ;;  %v658_v50 = vadd.f32 %v642_v24, %v641_v41  ;;  %v623_v51 = vadd.f32 %v622_v46, %v602_v48  ;;  %v643_v52 = vmul.f32 %v602_v48, %v602_v48  ;;  %v654_v55 = vadd.f32 %v653_v45, %v639_v43 }
 0x216   : > { %v619_v53 = vadd.f32 %v618_v47, %v600_v44  ;;  %v644_v56 = vmul.f32 %v604_v49, %v604_v49 }
 0x217   : > { %v555_v57 = vpop.f32.mrb[8].mxu0  ;;  %v624_v58 = vadd.f32 %v623_v51, %v604_v49  ;;  %v659_v59 = vadd.f32 %v658_v50, %v643_v52  ;;  %v655_v62 = vadd.f32 %v654_v55, %v640_v54 }
 0x218   : > { %620 = vadd.xlane.f32.xlu0 %v619_v53  ;;  %v645_v60 = vmul.f32 %v555_v57, %v555_v57  ;;  %v557_v61 = vpop.f32.mrb[9].mxu0 }
 0x219   : > { %v627_v63 = vadd.f32 %v557_v61, %v555_v57  ;;  %v646_v0 = vmul.f32 %v557_v61, %v557_v61  ;;  %625 = vadd.xlane.f32.xlu1 %v624_v58  ;;  %v559_v1 = vpop.f32.mrb[10].mxu0  ;;  %v660_v3 = vadd.f32 %v659_v59, %v644_v56 }
 0x21a   : > { %v608_v2 = vpop.f32.mrb[8].mxu1  ;;  %v649_v4 = vmul.f32 %v559_v1, %v559_v1  ;;  %v561_v6 = vpop.f32.mrb[11].mxu0 }
 0x21b   : > { %v647_v5 = vmul.f32 %v608_v2, %v608_v2  ;;  %v610_v7 = vpop.f32.mrb[9].mxu1  ;;  %v663_v8 = vadd.f32 %v646_v0, %v645_v60  ;;  %v628_v9 = vadd.f32 %v627_v63, %v608_v2  ;;  %v632_v10 = vadd.f32 %v561_v6, %v559_v1 }
 0x21c   : > { %661 = vadd.xlane.f32.xlu0 %v660_v3  ;;  %v650_v11 = vmul.f32 %v561_v6, %v561_v6  ;;  %v612_v12 = vpop.f32.mrb[10].mxu1  ;;  %v648_v18 = vmul.f32 %v610_v7, %v610_v7 }
 0x21d   : > { %v614_v13 = vpop.f32.mrb[11].mxu1  ;;  %v633_v15 = vadd.f32 %v632_v10, %v612_v12  ;;  %v651_v16 = vmul.f32 %v612_v12, %v612_v12  ;;  %656 = vadd.xlane.f32.xlu1 %v655_v62  ;;  %v629_v17 = vadd.f32 %v628_v9, %v610_v7  ;;  %v664_v19 = vadd.f32 %v663_v8, %v647_v5 }
 0x21e   : > { %v668_v14 = vadd.f32 %v650_v11, %v649_v4  ;;  %v652_v21 = vmul.f32 %v614_v13, %v614_v13 }
 0x21f   : > { %v634_v20 = vadd.f32 %v633_v15, %v614_v13  ;;  %v665_v23 = vadd.f32 %v664_v19, %v648_v18 }
 0x220   : > { %630 = vadd.xlane.f32.xlu0 %v629_v17  ;;  %v669_v22 = vadd.f32 %v668_v14, %v651_v16 }
 0x221   : > { %666 = vadd.xlane.f32.xlu1 %v665_v23 }
 0x222   : > { %v670_v25 = vadd.f32 %v669_v22, %v652_v21 }
 0x224   : > { %635 = vadd.xlane.f32.xlu0 %v634_v20 }
 0x228   : > { %671 = vadd.xlane.f32.xlu0 %v670_v25 }
 0x2a5   : > { %v621_v26 = vpop.xlane.xlu0 %620 }
 0x2a6   : > { %v626_v27 = vpop.xlane.xlu1 %625 }
 0x2a9   : > { %v662_v29 = vpop.xlane.xlu0 %661 }
 0x2aa   : > { %v679_v30 = vsel %vm677_vm11, %v626_v27, %v662_v29  ;;  %v657_v33 = vpop.xlane.xlu1 %656 }
 0x2ab   : > { %v683_v32 = vadd.f32 %v679_v30, %v674_v28  ;;  %v678_v34 = vsel %vm677_vm11, %v621_v26, %v657_v33 }
 0x2ac   : > { %v682_v35 = vadd.f32 %v678_v34, %v673_v31 }
 0x2ad   : > { %688 = vst.msk [vmem:[#allocation2 + $0x8] sm:$0xff] %vm686_vm12, %v683_v32  ;;  %v631_v36 = vpop.xlane.xlu0 %630 }
 0x2ae   : > { %687 = vst.msk [vmem:[#allocation2] sm:$0xff] %vm686_vm12, %v682_v35  ;;  %v667_v38 = vpop.xlane.xlu1 %666 }
 0x2af   : > { %v680_v39 = vsel %vm677_vm11, %v631_v36, %v667_v38 }
 0x2b0   : > { %v684_v41 = vadd.f32 %v680_v39, %v675_v37 }
 0x2b1   : > { %v636_v40 = vpop.xlane.xlu0 %635 }
 0x2b2   : > { %689 = vst.msk [vmem:[#allocation2 + $0x10] sm:$0xff] %vm686_vm12, %v684_v41 }
 0x2b3   : > { %696 = sbr.rel (%p1126_p12) target bundleno = 706 (0x2c2), region = 75 }
 0x2b4   : > { %v698_v24 = vld [vmem:[#allocation2 + $0x8] sm:$0xff] (!%p1126_p12) }
 0x2b5   : > { %v672_v43 = vpop.xlane.xlu0 %671  ;;  %v697_v46 = vld [vmem:[#allocation2] sm:$0xff] (!%p1126_p12)  ;;  %702 = vst.msk [vmem:[%s1182_s5 + $0x8] sm:$0xff] (!%p1126_p12), %vm686_vm12, %v698_v24 }
 0x2b6   : > { %v681_v44 = vsel %vm677_vm11, %v636_v40, %v672_v43  ;;  %701 = vst.msk [vmem:[%s1182_s5] sm:$0xff] (!%p1126_p12), %vm686_vm12, %v697_v46 }
 0x2b7   : > { %v685_v45 = vadd.f32 %v681_v44, %v676_v42 }
 0x2b9   : > { %690 = vst.msk [vmem:[#allocation2 + $0x18] sm:$0xff] %vm686_vm12, %v685_v45  ;;  %v699_v47 = vld [vmem:[#allocation2 + $0x10] sm:$0xff] (!%p1126_p12) }
 0x2ba   : > { %703 = vst.msk [vmem:[%s1182_s5 + $0x10] sm:$0xff] %vm686_vm12, %v699_v47 }
 0x2c0   : > { %v700_v48 = vld [vmem:[#allocation2 + $0x18] sm:$0xff] }
 0x2c1   : > { %704 = vst.msk [vmem:[%s1182_s5 + $0x18] sm:$0xff] %vm686_vm12, %v700_v48 }
 0x2c2 PF: > { %s16_s24 = sadd.s32 1, %s937_s24   ;;  %s1189_s18 = smov %s917_s19 }
 0x2c3   : > { %p13_p13 = scmp.ge.s32.totalorder %s16_s24, 10   ;;  %s1190_s19 = smov %s1046_s13 }
 0x2c4   : > { %s1191_s20 = smov %s929_s22  ;;  %s1192_s21 = smov %s933_s23 }
 0x2c5   : > { %s1193_s22 = smov %s1196_s26  ;;  %s1194_s23 = smov %s1200_s27 }
 0x2c6   :  { %15 = sbr.rel (!%p13_p13) target bundleno = 4 (0x4), region = 107 }
 0x2cd   :  { %716 = vsyncpa [#allocation5], 1 }
 0x2ce   :  { %718 = vsyncpa [#allocation5 + $0x1], 1 }

// kernel: residual_stack_pallas.11
= control target key start
LH: loop header
LB: loop body
LE: loop exit
PB: predicated region body
PF: predicated region fallthrough
CT: control target
= control target key end

     0   :  { %s1492_s0 = inlined_call_operand.vmem [shape: f32[4,32,1024], index: 0, kind: input, shape index: {}, may-alias: {0,6}]   ;;  %s1493_s1 = inlined_call_operand.vmem [shape: bf16[16,32], index: 1, kind: input, shape index: {}]   ;;  %s1494_s2 = inlined_call_operand.vmem [shape: f32[16,2], index: 2, kind: input, shape index: {}]   ;;  %s1495_s3 = inlined_call_operand.vmem [shape: bf16[32,16], index: 3, kind: input, shape index: {}]   ;;  %s1496_s4 = inlined_call_operand.vmem [shape: f32[32,2], index: 4, kind: input, shape index: {}]   ;;  %s1497_s5 = inlined_call_operand.vmem [shape: f32[2], index: 5, kind: input, shape index: {}]   ;;  %s1498_s6 = inlined_call_operand.vmem [shape: f32[4,32,1024], index: 6, kind: output, shape index: {}, may-alias: {0,6}]  }
   0x1   :  { %1500 = sst [smem:[#allocation7_spill]] %s1497_s5 }
   0x2   :  { %11 = vsyncpa [#allocation4], 0  ;;  %s1163_s21 = smov 0   ;;  %s1165_s22 = smov 0  }
   0x3   :  { %s1167_s23 = smov 0   ;;  %s1169_s24 = smov 0  }
   0x4   :  { %s1171_s25 = smov 0   ;;  %s1173_s26 = smov 0  }
   0x5   :  { %s1175_s27 = smov 0  }
   0x6 LB: > { %s944_s28 = sadd.s32 4294967295, %s1123_s27   ;;  %s26_s29 = sadd.s32 1, %s1115_s25  ;;  %s1123_s27 = sphi %s1175_s27, %s17_s27   ;;  %s1119_s26 = sphi %s1173_s26, %s1513_s26   ;;  %s1115_s25 = sphi %s1171_s25, %s1512_s25   ;;  %s1111_s24 = sphi %s1169_s24, %s1511_s24   ;;  %s1107_s23 = sphi %s1167_s23, %s1510_s23   ;;  %s1103_s22 = sphi %s1165_s22, %s1509_s22   ;;  %s1099_s21 = sphi %s1163_s21, %s1508_s21  }
   0x7   : > { %p27_p0 = scmp.ge.s32.totalorder %s26_s29, 2  ;;  %s29_s30 = sadd.s32 1, %s1119_s26 }
   0x8   : > { %s38_s7 = sadd.s32 1, %s1103_s22  ;;  %p45_p1 = scmp.ne.s32.totalorder %s1103_s22, %s1099_s21 }
   0x9   : > { %s1515_s29 = smov (%p27_p0, %s26_s29), 0  ;;  %s1517_s30 = smov (!%p27_p0, %s29_s30), %s1119_s26 }
   0xa   : > { %s34_s8 = ssub.s32 %s1115_s25, %s1515_s29  ;;  %p46_p2 = scmp.eq.s32.totalorder %s1123_s27, 0 }
   0xb   : > { %p31_p3 = scmp.ge.s32.totalorder %s1517_s30, 4  ;;  %p182_p4 = scmp.eq.s32.totalorder %s944_s28, 7 }
   0xc   : > { %p1210_p5 = por %p46_p2, %p45_p1  ;;  %p946_p6 = scmp.ge.s32.totalorder %s1123_s27, 1 }
   0xd   : > { %s1519_s30 = smov (%p31_p3, %s1517_s30), 0  ;;  %p1217_p7 = por %p182_p4, %p45_p1 }
   0xe   : > { %p195_p8 = scmp.lt.s32.totalorder %s1123_s27, 9  ;;  %s33_s11 = ssub.s32 %s1119_s26, %s1519_s30 }
   0xf   : > { %s1502_s10 = scalar_select %p1217_p7, 1, 0 }
  0x10   : > { %s35_s12 = sor.u32 %s34_s8, %s33_s11  ;;  %p1224_p9 = pnand %p946_p6, %p195_p8 }
  0x11   : > { %p36_p10 = scmp.eq.s32.totalorder %s35_s12, 0  ;;  %p1228_p11 = scmp.eq.s32.totalorder %s944_s28, 0 }
  0x12   : > { %s1503_s13 = scalar_select %p1224_p9, 1, 0 }
  0x13   : > { %p977_p12 = pneg %p1224_p9  ;;  %s1505_s5 = sld [smem:[#allocation7_spill]] }
  0x14   : > { %s1238_s18 = scalar_select %p36_p10, %s1103_s22, %s38_s7  }
  0x15   : > { %p978_p13 = pnand %p1228_p11, %p977_p12 }
  0x17   : > { %p1052_p1 = pneg %p978_p13 }
  0x19   : > { %s220_s17 = sshll.u32 %s1505_s5, 4  ;;  %s221_s17 = int_to_ptr.vmem [resolvable:$true] %s220_s17 }
  0x1a   : > { %s1050_s19 = scalar_lea.vmem %s221_s17, 16  ;;  %p1058_p4 = scmp.lt.s32.totalorder %s221_s17, %s221_s17 }
  0x1b   : > { %p1051_p0 = scmp.ne.s32.totalorder %s221_s17, %s1050_s19  ;;  %p1059_p6 = scmp.lt.s32.totalorder %s1050_s19, %s1050_s19 }
  0x1d   : > { %p1053_p2 = pnand %p1052_p1, %p1051_p0  ;;  %p1060_p8 = por %p1059_p6, %p1058_p4 }
  0x1f   : > { %p1054_p3 = pneg %p1053_p2 }
  0x21   : > { %p1061_p7 = pnand %p1060_p8, %p1054_p3 }
  0x23   : > { %1064 = shalt.err (!%p1061_p7)
}
  0x24   : > { %s1125_s20 = smov [#allocation3]   ;;  %p948_p9 = scmp.ge.s32.totalorder %s1123_s27, 8 }
  0x25   : > { %980 = dma.vmem_to_smem (!%p978_p13), %s221_s17, 16, %s1125_s20, [#allocation4]  }
  0x26   : > { %227 = sbr.rel (%p948_p9) target bundleno = 60 (0x3c), region = 36 }
  0x2d   : > { %230 = sbr.rel (!%p1210_p5) target bundleno = 60 (0x3c), region = 40  ;;  %s232_s28 = sand.u32 (%p1210_p5), 1, %s1103_s22  }
  0x2e   : > { %s950_s7 = sshll.u32 (%p1210_p5), %s1115_s25, 2  ;;  %s949_s8 = sshll.u32 (%p1210_p5), %s232_s28, 7 }
  0x2f   : > { %s951_s11 = sshll.u32 (%p1210_p5), %s1119_s26, 5  ;;  %s234_s9 = scalar_lea.vmem (%p1210_p5), [#allocation2], %s949_s8 }
  0x30   : > { %s237_s12 = sadd.s32 (%p1210_p5), %s951_s11, %s950_s7 }
  0x31   : > { %s952_s15 = sshll.u32 (%p1210_p5), %s237_s12, 3 }
  0x32   : > { %s1251_s5 = scalar_lea.vmem (%p1210_p5), %s1492_s0, %s952_s15 }
  0x33   : > { %v252_v0 = vld [vmem:[%s1251_s5] sm:$0xff] (%p1210_p5)  ;;  %v254_v1 = vld [vmem:[%s1251_s5 + $0x8] sm:$0xff] (%p1210_p5)  ;;  %v256_v2 = vld [vmem:[%s1251_s5 + $0x10] sm:$0xff] (%p1210_p5) }
  0x34   : > { %253 = vst [vmem:[%s234_s9] sm:$0xff] %v252_v0  ;;  %255 = vst [vmem:[%s234_s9 + $0x8] sm:$0xff] %v254_v1  ;;  %v258_v3 = vld [vmem:[%s1251_s5 + $0x18] sm:$0xff]  ;;  %v260_v4 = vld [vmem:[%s1251_s5 + $0x40] sm:$0xff] }
  0x35   : > { %257 = vst [vmem:[%s234_s9 + $0x10] sm:$0xff] %v256_v2  ;;  %v262_v5 = vld [vmem:[%s1251_s5 + $0x48] sm:$0xff]  ;;  %259 = vst [vmem:[%s234_s9 + $0x18] sm:$0xff] %v258_v3  ;;  %v264_v6 = vld [vmem:[%s1251_s5 + $0x50] sm:$0xff] }
  0x36   : > { %261 = vst [vmem:[%s234_s9 + $0x20] sm:$0xff] %v260_v4  ;;  %263 = vst [vmem:[%s234_s9 + $0x28] sm:$0xff] %v262_v5  ;;  %v266_v7 = vld [vmem:[%s1251_s5 + $0x58] sm:$0xff]  ;;  %v268_v8 = vld [vmem:[%s1251_s5 + $0x80] sm:$0xff] }
  0x37   : > { %265 = vst [vmem:[%s234_s9 + $0x30] sm:$0xff] %v264_v6  ;;  %267 = vst [vmem:[%s234_s9 + $0x38] sm:$0xff] %v266_v7  ;;  %v270_v9 = vld [vmem:[%s1251_s5 + $0x88] sm:$0xff]  ;;  %v272_v10 = vld [vmem:[%s1251_s5 + $0x90] sm:$0xff] }
  0x38   : > { %269 = vst [vmem:[%s234_s9 + $0x40] sm:$0xff] %v268_v8  ;;  %v274_v11 = vld [vmem:[%s1251_s5 + $0x98] sm:$0xff]  ;;  %271 = vst [vmem:[%s234_s9 + $0x48] sm:$0xff] %v270_v9  ;;  %v276_v12 = vld [vmem:[%s1251_s5 + $0xc0] sm:$0xff] }
  0x39   : > { %273 = vst [vmem:[%s234_s9 + $0x50] sm:$0xff] %v272_v10  ;;  %275 = vst [vmem:[%s234_s9 + $0x58] sm:$0xff] %v274_v11  ;;  %v278_v13 = vld [vmem:[%s1251_s5 + $0xc8] sm:$0xff]  ;;  %v280_v14 = vld [vmem:[%s1251_s5 + $0xd0] sm:$0xff] }
  0x3a   : > { %277 = vst [vmem:[%s234_s9 + $0x60] sm:$0xff] %v276_v12  ;;  %279 = vst [vmem:[%s234_s9 + $0x68] sm:$0xff] %v278_v13  ;;  %v282_v15 = vld [vmem:[%s1251_s5 + $0xd8] sm:$0xff] }
  0x3b   : > { %281 = vst [vmem:[%s234_s9 + $0x70] sm:$0xff] %v280_v14  ;;  %283 = vst [vmem:[%s234_s9 + $0x78] sm:$0xff] %v282_v15 }
  0x3c PF: > { %p1506_p5 = scmp.ne.s32.totalorder %s1503_s13, 0 }
  0x3d   : > { %s295_s17 = sand.u32 (!%p1506_p5), 1, %s1099_s21  }
  0x3e   : > { %292 = sbr.rel (%p1506_p5) target bundleno = 563 (0x233), region = 63  ;;  %s1272_s20 = sshll.u32 (!%p1506_p5), %s295_s17, 7 }
  0x3f   : > { %s1275_s28 = scalar_lea.vmem (!%p1506_p5), [#allocation2], %s1272_s20 }
  0x45   : > { %1094 = dma.done.wait (%p1228_p11), [#allocation4], 16  }
  0x46   : > { %1096 = vsyncadd (%p1228_p11), [#allocation4], 4294967280 }
  0x47   : > { %305 = sfence }
  0x48   : > { %v1282_v16 = vld [vmem:[%s1275_s28 + $0x8] sm:$0xff]  ;;  %v1288_v18 = vld [vmem:[%s1275_s28 + $0x18] sm:$0xff]  ;;  %v1296_v21 = vld [vmem:[%s1275_s28] sm:$0xff]  ;;  %v1126_v23 = vmov 0   ;;  %v1127_v29 = vmov 1   ;;  %vm362_vm0 = vcmask 261120  }
  0x49   : > { %v1285_v17 = vld [vmem:[%s1275_s28 + $0x28] sm:$0xff]  ;;  %v1293_v20 = vld [vmem:[%s1275_s28 + $0x38] sm:$0xff]  ;;  %v1299_v22 = vld [vmem:[%s1275_s28 + $0x20] sm:$0xff]  ;;  %398 = vmatprep.mubr.bf16.mxu0 %v1126_v23  ;;  %441 = vmatprep.mubr.bf16.mxu1 %v1126_v23  ;;  %s496_s5 = sld [smem:[#allocation3]]  ;;  %vm532_vm9 = vcmask 130048   ;;  %s966_s8 = sld [smem:[#allocation3 + $0x1]] }
  0x4a   : > { %v350_v19 = vpack.c.bf16 %v1285_v17, %v1282_v16  ;;  %v352_v24 = vpack.c.bf16 %v1293_v20, %v1288_v18  ;;  %v349_v25 = vpack.c.bf16 %v1299_v22, %v1296_v21  ;;  %v1308_v26 = vld [vmem:[%s1275_s28 + $0x10] sm:$0xff]  ;;  %v1314_v28 = vld [vmem:[%s1275_s28 + $0x48] sm:$0xff]  ;;  %1042 = vset.pattern.permute.xlu0 %v1126_v23  ;;  %1043 = vset.pattern.permute.xlu1 %v1127_v29  ;;  %v1323_v32 = vld [vmem:[%s1275_s28 + $0x58] sm:$0xff]  ;;  %s1394_s11 = scalar_lea.vmem [#allocation5], %s1272_s20  ;;  %p1507_p7 = scmp.ne.s32.totalorder %s1502_s10, 0 }
  0x4b   : > { %v1311_v27 = vld [vmem:[%s1275_s28 + $0x30] sm:$0xff]  ;;  %v1320_v31 = vld [vmem:[%s1275_s28 + $0x68] sm:$0xff]  ;;  %v1326_v33 = vld [vmem:[%s1275_s28 + $0x78] sm:$0xff]  ;;  %s968_s20 = sshll.u32 (%p1507_p7), %s1107_s23, 2  ;;  %s969_s12 = sshll.u32 (%p1507_p7), %s1111_s24, 5 }
  0x4c   : > { %366 = vmatprep.subr.bf16.mxu0 %v350_v19  ;;  %v351_v30 = vpack.c.bf16 %v1311_v27, %v1308_v26  ;;  %409 = vmatprep.subr.bf16.mxu1 %v352_v24  ;;  %v354_v34 = vpack.c.bf16 %v1320_v31, %v1314_v28  ;;  %v356_v35 = vpack.c.bf16 %v1326_v33, %v1323_v32  ;;  %v1333_v36 = vld [vmem:[%s1275_s28 + $0x40] sm:$0xff]  ;;  %v1339_v38 = vld [vmem:[%s1275_s28 + $0x50] sm:$0xff]  ;;  %v453_v44 = vld [vmem:[%s1494_s2 + $0x8] sm:$0xff]  ;;  %s808_s10 = sadd.s32 (%p1507_p7), %s969_s12, %s968_s20 }
  0x4d   : > { %367 = vmatpush1.bf16.msra.mxu0 %v349_v25  ;;  %v1336_v37 = vld [vmem:[%s1275_s28 + $0x60] sm:$0xff]  ;;  %v1344_v40 = vld [vmem:[%s1275_s28 + $0x70] sm:$0xff]  ;;  %v646_v47 = vld [vmem:[%s1496_s4 + $0x8] sm:$0xff]  ;;  %s970_s15 = sshll.u32 (%p1507_p7), %s808_s10, 3 }
  0x4e   : > { %410 = vmatpush1.bf16.msra.mxu1 %v351_v30  ;;  %v353_v39 = vpack.c.bf16 %v1336_v37, %v1333_v36  ;;  %368 = vmatprep.subr.bf16.mxu0 %v354_v34  ;;  %v355_v41 = vpack.c.bf16 %v1344_v40, %v1339_v38  ;;  %v452_v42 = vld [vmem:[%s1494_s2] sm:$0xff]  ;;  %v647_v46 = vld [vmem:[%s1496_s4 + $0x10] sm:$0xff]  ;;  %v648_v48 = vld [vmem:[%s1496_s4 + $0x18] sm:$0xff]  ;;  %s810_s9 = scalar_lea.vmem (%p1507_p7), %s1498_s6, %s970_s15 }
  0x4f   : > { %411 = vmatprep.subr.bf16.mxu1 %v356_v35  ;;  %v1047_v43 = vld [vmem:[%s1493_s1] sm:$0xff]   ;;  %456 = vperm.xlu0 %1042, %v452_v42   ;;  %v497_v56 = vstv %s496_s5 }
  0x50   : > { %473 = vperm.xlu1 %1043, %v452_v42   ;;  %v645_v45 = vld [vmem:[%s1496_s4] sm:$0xff] }
  0x51   : > { %369 = vmatpush1.bf16.msra.mxu0 %v353_v39 }
  0x52   : > { %412 = vmatpush1.bf16.msra.mxu1 %v355_v41 }
  0x53   : > { %461 = vperm.xlu0 %1042, %v453_v44  }
  0x54   : > { %958 = vmatmul.mubr.msk.bf16.vlgmr.msra.gmra.mrb[0].mxu0 %vm362_vm0, %v1047_v43  ;;  %477 = vperm.xlu1 %1043, %v453_v44  }
  0x55   : > { %959 = vmatmul.mubr.msk.bf16.vlgmr.msra.gmra.mrb[0].mxu1 %vm362_vm0, %v1047_v43  ;;  %571 = vmatprep.mubr.bf16.mxu0 %v1126_v23 }
  0x56   : > { %624 = vmatprep.mubr.bf16.mxu1 %v1126_v23 }
  0x57   : > { %651 = vperm.xlu0 %1042, %v645_v45  }
  0x58   : > { %1044 = vset.pattern.permute.xlu1 %v1126_v23 }
  0x59   : > { %656 = vperm.xlu1 %1044, %v646_v47  }
  0x5b   : > { %661 = vperm.xlu0 %1042, %v647_v46  }
  0x5d   : > { %666 = vperm.xlu1 %1044, %v648_v48  }
  0x5f   : > { %1045 = vset.pattern.permute.xlu0 %v1127_v29 }
  0x60   : > { %686 = vperm.xlu0 %1045, %v645_v45  }
  0x61   : > { %1046 = vset.pattern.permute.xlu1 %v1127_v29 }
  0x62   : > { %690 = vperm.xlu1 %1046, %v646_v47  }
  0x64   : > { %698 = vperm.xlu0 %1045, %v648_v48  }
  0x66   : > { %694 = vperm.xlu1 %1046, %v647_v46  }
  0xce   : > { %v457_v49 = vpop.permute.xlu0 %456 }
  0xcf   : > { %v474_v50 = vpop.permute.xlu1 %473 }
  0xd2   : > { %v462_v51 = vpop.permute.xlu0 %461 }
  0xd3   : > { %v478_v3 = vpop.permute.xlu1 %477 }
 0x127   : > { %v400_v52 = vpop.f32.mrb[0].mxu0 }
 0x128   : > { %v464_v53 = vmul.f32 %v457_v49, %v400_v52  ;;  %v443_v54 = vpop.f32.mrb[0].mxu1  ;;  %v402_v55 = vpop.f32.mrb[1].mxu0  ;;  %v1049_v52 = vld [vmem:[%s1495_s3 + $0x8] sm:$0xff]  }
 0x129   : > { %v466_v57 = vmul.f32 %v457_v49, %v443_v54  ;;  %v465_v58 = vmul.f32 %v457_v49, %v402_v55  ;;  %v445_v59 = vpop.f32.mrb[1].mxu1  ;;  %v404_v60 = vpop.f32.mrb[2].mxu0 }
 0x12a   : > { %v480_v61 = vadd.f32 %v474_v50, %v464_v53  ;;  %v467_v62 = vmul.f32 %v457_v49, %v445_v59  ;;  %v468_v63 = vmul.f32 %v462_v51, %v404_v60  ;;  %v447_v0 = vpop.f32.mrb[2].mxu1  ;;  %v406_v1 = vpop.f32.mrb[3].mxu0 }
 0x12b   : > { %v482_v2 = vadd.f32 %v474_v50, %v466_v57  ;;  %v481_v4 = vadd.f32 %v474_v50, %v465_v58  ;;  %v470_v5 = vmul.f32 %v462_v51, %v447_v0  ;;  %v469_v6 = vmul.f32 %v462_v51, %v406_v1  ;;  %v449_v7 = vpop.f32.mrb[3].mxu1  ;;  %v652_v53 = vpop.permute.xlu0 %651 }
 0x12c   : > { %v498_v8 = vmul.f32 %v497_v56, %v480_v61  ;;  %v484_v9 = vadd.f32 %v478_v3, %v468_v63  ;;  %vm488_vm1 = vcmp.gt.f32.partialorder %v480_v61, 0.0  ;;  %v483_v11 = vadd.f32 %v474_v50, %v467_v62  ;;  %v657_v54 = vpop.permute.xlu1 %656 }
 0x12d   : > { %v500_v10 = vmul.f32 %v497_v56, %v482_v2  ;;  %v499_v12 = vmul.f32 %v497_v56, %v481_v4  ;;  %v486_v14 = vadd.f32 %v478_v3, %v470_v5  ;;  %v485_v15 = vadd.f32 %v478_v3, %v469_v6 }
 0x12e   : > { %vm492_vm2 = vcmp.gt.f32.partialorder %v484_v9, 0.0  ;;  %v502_v13 = vmul.f32 %v497_v56, %v484_v9  ;;  %v506_v19 = vsel %vm488_vm1, %v480_v61, %v498_v8  ;;  %vm490_vm3 = vcmp.gt.f32.partialorder %v482_v2, 0.0 }
 0x12f   : > { %vm489_vm4 = vcmp.gt.f32.partialorder %v481_v4, 0.0  ;;  %v471_v24 = vmul.f32 %v462_v51, %v449_v7  ;;  %vm494_vm5 = vcmp.gt.f32.partialorder %v486_v14, 0.0  ;;  %v504_v29 = vmul.f32 %v497_v56, %v486_v14  ;;  %v1048_v51 = vld [vmem:[%s1495_s3] sm:$0xff]   ;;  %v1380_v55 = vpop.permute.xlu0 %661 }
 0x130   : > { %v510_v25 = vsel %vm492_vm2, %v484_v9, %v502_v13  ;;  %vm493_vm6 = vcmp.gt.f32.partialorder %v485_v15, 0.0  ;;  %v501_v30 = vmul.f32 %v497_v56, %v483_v11  ;;  %v503_v34 = vmul.f32 %v497_v56, %v485_v15 }
 0x131   : > { %v487_v35 = vadd.f32 %v478_v3, %v471_v24  ;;  %v518_v39 = vpack.c.bf16 %v510_v25, %v506_v19  ;;  %v508_v41 = vsel %vm490_vm3, %v482_v2, %v500_v10  ;;  %vm491_vm7 = vcmp.gt.f32.partialorder %v483_v11, 0.0 }
 0x132   : > { %v512_v42 = vsel %vm494_vm5, %v486_v14, %v504_v29  ;;  %v507_v43 = vsel %vm489_vm4, %v481_v4, %v499_v12  ;;  %v511_v45 = vsel %vm493_vm6, %v485_v15, %v503_v34  ;;  %v509_v48 = vsel %vm491_vm7, %v483_v11, %v501_v30 }
 0x133   : > { %vm495_vm8 = vcmp.gt.f32.partialorder %v487_v35, 0.0  ;;  %v505_v44 = vmul.f32 %v497_v56, %v487_v35  ;;  %v520_v46 = vpack.c.bf16 %v512_v42, %v508_v41  ;;  %v519_v47 = vpack.c.bf16 %v511_v45, %v507_v43  ;;  %v1382_v56 = vpop.permute.xlu1 %666  ;;  %v687_v58 = vpop.permute.xlu0 %686 }
 0x135   : > { %v513_v49 = vsel %vm495_vm8, %v487_v35, %v505_v44  ;;  %539 = vmatprep.subr.bf16.mxu0 %v519_v47 }
 0x136   : > { %v521_v50 = vpack.c.bf16 %v513_v49, %v509_v48  ;;  %540 = vmatpush1.bf16.msra.mxu0 %v518_v39 }
 0x137   : > { %v691_v9 = vpop.permute.xlu1 %690 }
 0x138   : > { %592 = vmatprep.subr.bf16.mxu1 %v521_v50 }
 0x139   : > { %593 = vmatpush1.bf16.msra.mxu1 %v520_v46  ;;  %962 = vmatmul.mubr.msk.bf16.vlgmr.msra.gmra.mrb[4].mxu0 %vm532_vm9, %v1048_v51 }
 0x13a   : > { %581 = vmatprep.mubr.bf16.mxu0 %v1126_v23 }
 0x13c   : > { %964 = vmatmul.mubr.msk.bf16.vlgmr.msra.gmra.mrb[4].mxu1 %vm532_vm9, %v1048_v51 }
 0x13d   : > { %634 = vmatprep.mubr.bf16.mxu1 %v1126_v23  ;;  %v1384_v23 = vstv %s966_s8 }
 0x141   : > { %963 = vmatmul.mubr.msk.bf16.gmra.mrb[8].mxu0 %vm532_vm9, %v1049_v52 }
 0x144   : > { %965 = vmatmul.mubr.msk.bf16.gmra.mrb[8].mxu1 %vm532_vm9, %v1049_v52 }
 0x20c   : > { %v573_v57 = vpop.f32.mrb[4].mxu0 }
 0x20d   : > { %v669_v59 = vmul.f32 %v652_v53, %v573_v57  ;;  %v575_v60 = vpop.f32.mrb[5].mxu0 }
 0x20e   : > { %v670_v62 = vmul.f32 %v652_v53, %v575_v60  ;;  %v577_v63 = vpop.f32.mrb[6].mxu0 }
 0x20f   : > { %v626_v61 = vpop.f32.mrb[4].mxu1  ;;  %v701_v2 = vadd.f32 %v687_v58, %v669_v59  ;;  %v673_v3 = vmul.f32 %v657_v54, %v577_v63  ;;  %v579_v4 = vpop.f32.mrb[7].mxu0 }
 0x210   : > { %v671_v0 = vmul.f32 %v652_v53, %v626_v61  ;;  %v628_v1 = vpop.f32.mrb[5].mxu1  ;;  %v702_v6 = vadd.f32 %v687_v58, %v670_v62  ;;  %v674_v8 = vmul.f32 %v657_v54, %v579_v4  ;;  %v695_v61 = vpop.permute.xlu1 %694 }
 0x211   : > { %v672_v5 = vmul.f32 %v652_v53, %v628_v1  ;;  %v630_v7 = vpop.f32.mrb[6].mxu1  ;;  %vm717_vm10 = vcmp.gt.f32.partialorder %v701_v2, 0.0  ;;  %v735_v11 = vmul.f32 %v1384_v23, %v701_v2  ;;  %v705_v29 = vadd.f32 %v691_v9, %v673_v3 }
 0x212   : > { %v703_v10 = vadd.f32 %v687_v58, %v671_v0  ;;  %v675_v12 = vmul.f32 %v657_v54, %v630_v7  ;;  %v632_v13 = vpop.f32.mrb[7].mxu1  ;;  %vm718_vm11 = vcmp.gt.f32.partialorder %v702_v6, 0.0  ;;  %v736_v15 = vmul.f32 %v1384_v23, %v702_v6 }
 0x213   : > { %v704_v14 = vadd.f32 %v687_v58, %v672_v5  ;;  %v676_v19 = vmul.f32 %v657_v54, %v632_v13  ;;  %v751_v25 = vsel %vm717_vm10, %v701_v2, %v735_v11  ;;  %v706_v43 = vadd.f32 %v691_v9, %v674_v8 }
 0x214   : > { %vm719_vm12 = vcmp.gt.f32.partialorder %v703_v10, 0.0  ;;  %v737_v24 = vmul.f32 %v1384_v23, %v703_v10  ;;  %v752_v34 = vsel %vm718_vm11, %v702_v6, %v736_v15  ;;  %v767_v35 = vadd.f32 %v751_v25, %v1296_v21  ;;  %v583_v39 = vpop.f32.mrb[8].mxu0 }
 0x215   : > { %vm720_vm13 = vcmp.gt.f32.partialorder %v704_v14, 0.0  ;;  %v738_v30 = vmul.f32 %v1384_v23, %v704_v14  ;;  %v768_v42 = vadd.f32 %v752_v34, %v1282_v16  ;;  %v707_v44 = vadd.f32 %v691_v9, %v675_v12  ;;  %v585_v45 = vpop.f32.mrb[9].mxu0 }
 0x216   : > { %v753_v41 = vsel %vm719_vm12, %v703_v10, %v737_v24  ;;  %783 = vst [vmem:[%s1394_s11] sm:$0xff] %v767_v35  ;;  %v708_v48 = vadd.f32 %v691_v9, %v676_v19  ;;  %vm721_vm14 = vcmp.gt.f32.partialorder %v705_v29, 0.0  ;;  %v587_v49 = vpop.f32.mrb[10].mxu0  ;;  %vm722_vm15 = vcmp.gt.f32.partialorder %v706_v43, 0.0 }
 0x217   : > { %v754_v46 = vsel %vm720_vm13, %v704_v14, %v738_v30  ;;  %v769_v47 = vadd.f32 %v753_v41, %v1308_v26  ;;  %v636_v21 = vpop.f32.mrb[8].mxu1  ;;  %784 = vst [vmem:[%s1394_s11 + $0x8] sm:$0xff] %v768_v42  ;;  %vm723_vm0 = vcmp.gt.f32.partialorder %v707_v44, 0.0  ;;  %v739_v16 = vmul.f32 %v1384_v23, %v705_v29  ;;  %v589_v26 = vpop.f32.mrb[11].mxu0 }
 0x218   : > { %v770_v50 = vadd.f32 %v754_v46, %v1288_v18  ;;  %v638_v51 = vpop.f32.mrb[9].mxu1  ;;  %vm724_vm1 = vcmp.gt.f32.partialorder %v708_v48, 0.0  ;;  %v740_v52 = vmul.f32 %v1384_v23, %v706_v43  ;;  %v741_v53 = vmul.f32 %v1384_v23, %v707_v44  ;;  %v699_v14 = vpop.permute.xlu0 %698 }
 0x219   : > { %785 = vst [vmem:[%s1394_s11 + $0x10] sm:$0xff] %v769_v47  ;;  %v742_v54 = vmul.f32 %v1384_v23, %v708_v48  ;;  %v640_v57 = vpop.f32.mrb[10].mxu1  ;;  %v755_v18 = vsel %vm721_vm14, %v705_v29, %v739_v16  ;;  %v677_v58 = vmul.f32 %v1380_v55, %v583_v39  ;;  %v679_v59 = vmul.f32 %v1380_v55, %v636_v21 }
 0x21a   : > { %786 = vst [vmem:[%s1394_s11 + $0x18] sm:$0xff] %v770_v50  ;;  %v678_v60 = vmul.f32 %v1380_v55, %v585_v45  ;;  %v642_v62 = vpop.f32.mrb[11].mxu1  ;;  %v756_v63 = vsel %vm722_vm15, %v706_v43, %v740_v52  ;;  %v757_v0 = vsel %vm723_vm0, %v707_v44, %v741_v53  ;;  %v771_v2 = vadd.f32 %v755_v18, %v1299_v22 }
 0x21b   : > { %v758_v1 = vsel %vm724_vm1, %v708_v48, %v742_v54  ;;  %v772_v3 = vadd.f32 %v756_v63, %v1285_v17  ;;  %v773_v4 = vadd.f32 %v757_v0, %v1311_v27  ;;  %v680_v6 = vmul.f32 %v1380_v55, %v638_v51 }
 0x21c   : > { %v774_v5 = vadd.f32 %v758_v1, %v1293_v20  ;;  %787 = vst [vmem:[%s1394_s11 + $0x20] sm:$0xff] %v771_v2  ;;  %v709_v7 = vadd.f32 %v695_v61, %v677_v58  ;;  %v710_v8 = vadd.f32 %v695_v61, %v678_v60  ;;  %v711_v9 = vadd.f32 %v695_v61, %v679_v59 }
 0x21d   : > { %v681_v10 = vmul.f32 %v1382_v56, %v587_v49  ;;  %788 = vst [vmem:[%s1394_s11 + $0x28] sm:$0xff] %v772_v3  ;;  %789 = vst [vmem:[%s1394_s11 + $0x30] sm:$0xff] %v773_v4  ;;  %v712_v11 = vadd.f32 %v695_v61, %v680_v6  ;;  %v683_v22 = vmul.f32 %v1382_v56, %v640_v57 }
 0x21e   : > { %790 = vst [vmem:[%s1394_s11 + $0x38] sm:$0xff] %v774_v5  ;;  %v682_v17 = vmul.f32 %v1382_v56, %v589_v26  ;;  %v684_v27 = vmul.f32 %v1382_v56, %v642_v62  ;;  %vm725_vm2 = vcmp.gt.f32.partialorder %v709_v7, 0.0  ;;  %vm726_vm3 = vcmp.gt.f32.partialorder %v710_v8, 0.0 }
 0x21f   : > { %vm727_vm4 = vcmp.gt.f32.partialorder %v711_v9, 0.0  ;;  %v743_v20 = vmul.f32 %v1384_v23, %v709_v7  ;;  %vm728_vm5 = vcmp.gt.f32.partialorder %v712_v11, 0.0  ;;  %v744_v55 = vmul.f32 %v1384_v23, %v710_v8 }
 0x220   : > { %v745_v12 = vmul.f32 %v1384_v23, %v711_v9  ;;  %v746_v13 = vmul.f32 %v1384_v23, %v712_v11  ;;  %v713_v19 = vadd.f32 %v699_v14, %v681_v10  ;;  %v714_v24 = vadd.f32 %v699_v14, %v682_v17 }
 0x221   : > { %v759_v15 = vsel %vm725_vm2, %v709_v7, %v743_v20  ;;  %v715_v56 = vadd.f32 %v699_v14, %v683_v22  ;;  %v760_v25 = vsel %vm726_vm3, %v710_v8, %v744_v55  ;;  %v716_v42 = vadd.f32 %v699_v14, %v684_v27 }
 0x222   : > { %v761_v29 = vsel %vm727_vm4, %v711_v9, %v745_v12  ;;  %v762_v30 = vsel %vm728_vm5, %v712_v11, %v746_v13  ;;  %v775_v34 = vadd.f32 %v759_v15, %v1333_v36  ;;  %v776_v35 = vadd.f32 %v760_v25, %v1314_v28 }
 0x223   : > { %v777_v39 = vadd.f32 %v761_v29, %v1339_v38  ;;  %v778_v41 = vadd.f32 %v762_v30, %v1323_v32  ;;  %vm729_vm6 = vcmp.gt.f32.partialorder %v713_v19, 0.0  ;;  %vm730_vm7 = vcmp.gt.f32.partialorder %v714_v24, 0.0 }
 0x224   : > { %791 = vst [vmem:[%s1394_s11 + $0x40] sm:$0xff] %v775_v34  ;;  %vm731_vm8 = vcmp.gt.f32.partialorder %v715_v56, 0.0  ;;  %v747_v43 = vmul.f32 %v1384_v23, %v713_v19  ;;  %792 = vst [vmem:[%s1394_s11 + $0x48] sm:$0xff] %v776_v35  ;;  %vm732_vm9 = vcmp.gt.f32.partialorder %v716_v42, 0.0  ;;  %v748_v28 = vmul.f32 %v1384_v23, %v714_v24  ;;  %805 = sbr.rel (!%p1507_p7) target bundleno = 563 (0x233), region = 75  ;;  %v833_v50 = vld [vmem:[%s1394_s11 + $0x28] sm:$0xff] (%p1507_p7) }
 0x225   : > { %793 = vst [vmem:[%s1394_s11 + $0x50] sm:$0xff] %v777_v39  ;;  %794 = vst [vmem:[%s1394_s11 + $0x58] sm:$0xff] %v778_v41  ;;  %v749_v36 = vmul.f32 %v1384_v23, %v715_v56  ;;  %v750_v32 = vmul.f32 %v1384_v23, %v716_v42  ;;  %v831_v23 = vld [vmem:[%s1394_s11 + $0x20] sm:$0xff] (%p1507_p7)  ;;  %v835_v16 = vld [vmem:[%s1394_s11 + $0x30] sm:$0xff] (%p1507_p7) }
 0x226   : > { %v763_v38 = vsel %vm729_vm6, %v713_v19, %v747_v43  ;;  %v764_v44 = vsel %vm730_vm7, %v714_v24, %v748_v28  ;;  %v837_v51 = vld [vmem:[%s1394_s11 + $0x38] sm:$0xff] (%p1507_p7)  ;;  %832 = vst [vmem:[%s810_s9 + $0x40] sm:$0xff] (%p1507_p7), %v831_v23  ;;  %834 = vst [vmem:[%s810_s9 + $0x48] sm:$0xff] (%p1507_p7), %v833_v50 }
 0x227   : > { %v765_v45 = vsel %vm731_vm8, %v715_v56, %v749_v36  ;;  %v766_v46 = vsel %vm732_vm9, %v716_v42, %v750_v32  ;;  %v779_v47 = vadd.f32 %v763_v38, %v1336_v37  ;;  %v780_v48 = vadd.f32 %v764_v44, %v1320_v31  ;;  %v823_v31 = vld [vmem:[%s1394_s11] sm:$0xff] (%p1507_p7)  ;;  %v827_v37 = vld [vmem:[%s1394_s11 + $0x10] sm:$0xff] (%p1507_p7)  ;;  %836 = vst [vmem:[%s810_s9 + $0x50] sm:$0xff] (%p1507_p7), %v835_v16 }
 0x228   : > { %v781_v21 = vadd.f32 %v765_v45, %v1344_v40  ;;  %v782_v49 = vadd.f32 %v766_v46, %v1326_v33  ;;  %v825_v33 = vld [vmem:[%s1394_s11 + $0x8] sm:$0xff] (%p1507_p7)  ;;  %v829_v40 = vld [vmem:[%s1394_s11 + $0x18] sm:$0xff] (%p1507_p7)  ;;  %824 = vst [vmem:[%s810_s9] sm:$0xff] (%p1507_p7), %v823_v31  ;;  %828 = vst [vmem:[%s810_s9 + $0x10] sm:$0xff] (%p1507_p7), %v827_v37 }
 0x229   : > { %795 = vst [vmem:[%s1394_s11 + $0x60] sm:$0xff] %v779_v47  ;;  %796 = vst [vmem:[%s1394_s11 + $0x68] sm:$0xff] %v780_v48 }
 0x22a   : > { %797 = vst [vmem:[%s1394_s11 + $0x70] sm:$0xff] %v781_v21  ;;  %798 = vst [vmem:[%s1394_s11 + $0x78] sm:$0xff] %v782_v49 }
 0x22b   : > { %v839_v26 = vld [vmem:[%s1394_s11 + $0x40] sm:$0xff]  ;;  %v841_v52 = vld [vmem:[%s1394_s11 + $0x48] sm:$0xff]  ;;  %826 = vst [vmem:[%s810_s9 + $0x8] sm:$0xff] %v825_v33  ;;  %830 = vst [vmem:[%s810_s9 + $0x18] sm:$0xff] %v829_v40 }
 0x22c   : > { %v843_v53 = vld [vmem:[%s1394_s11 + $0x50] sm:$0xff]  ;;  %v845_v54 = vld [vmem:[%s1394_s11 + $0x58] sm:$0xff]  ;;  %838 = vst [vmem:[%s810_s9 + $0x58] sm:$0xff] %v837_v51  ;;  %840 = vst [vmem:[%s810_s9 + $0x80] sm:$0xff] %v839_v26 }
 0x22d   : > { %842 = vst [vmem:[%s810_s9 + $0x88] sm:$0xff] %v841_v52  ;;  %844 = vst [vmem:[%s810_s9 + $0x90] sm:$0xff] %v843_v53 }
 0x22e   : > { %846 = vst [vmem:[%s810_s9 + $0x98] sm:$0xff] %v845_v54 }
 0x230   : > { %v847_v57 = vld [vmem:[%s1394_s11 + $0x60] sm:$0xff]  ;;  %v849_v18 = vld [vmem:[%s1394_s11 + $0x68] sm:$0xff] }
 0x231   : > { %v851_v58 = vld [vmem:[%s1394_s11 + $0x70] sm:$0xff]  ;;  %848 = vst [vmem:[%s810_s9 + $0xc0] sm:$0xff] %v847_v57  ;;  %850 = vst [vmem:[%s810_s9 + $0xc8] sm:$0xff] %v849_v18  ;;  %v853_v59 = vld [vmem:[%s1394_s11 + $0x78] sm:$0xff] }
 0x232   : > { %852 = vst [vmem:[%s810_s9 + $0xd0] sm:$0xff] %v851_v58  ;;  %854 = vst [vmem:[%s810_s9 + $0xd8] sm:$0xff] %v853_v59 }
 0x233 PF: > { %s17_s27 = sadd.s32 1, %s1123_s27   ;;  %s1508_s21 = smov %s1103_s22 }
 0x234   : > { %p14_p9 = scmp.ge.s32.totalorder %s17_s27, 10   ;;  %s1509_s22 = smov %s1238_s18 }
 0x235   : > { %s1510_s23 = smov %s1115_s25  ;;  %s1511_s24 = smov %s1119_s26 }
 0x236   : > { %s1512_s25 = smov %s1515_s29  ;;  %s1513_s26 = smov %s1519_s30 }
 0x237   :  { %16 = sbr.rel (!%p14_p9) target bundleno = 6 (0x6), region = 130 }
 0x23e   :  { %870 = vsyncpa [#allocation4], 1 }
 0x23f   :  { %872 = vsyncpa [#allocation4 + $0x1], 1 }

// kernel: residual_stack_pallas.17
= control target key start
LH: loop header
LB: loop body
LE: loop exit
PB: predicated region body
PF: predicated region fallthrough
CT: control target
= control target key end

     0   :  { %s1610_s0 = inlined_call_operand.hbm [shape: f32[4,32,1024], index: 0, kind: input, shape index: {}, may-alias: {0,6}]   ;;  %s1611_s1 = inlined_call_operand.vmem [shape: bf16[16,32], index: 1, kind: input, shape index: {}]   ;;  %s1612_s2 = inlined_call_operand.vmem [shape: f32[16,2], index: 2, kind: input, shape index: {}]   ;;  %s1613_s3 = inlined_call_operand.vmem [shape: bf16[32,16], index: 3, kind: input, shape index: {}]   ;;  %s1614_s4 = inlined_call_operand.vmem [shape: f32[32,2], index: 4, kind: input, shape index: {}]   ;;  %s1615_s5 = inlined_call_operand.vmem [shape: f32[2], index: 5, kind: input, shape index: {}]   ;;  %s1616_s6 = inlined_call_operand.hbm [shape: f32[4,32,1024], index: 6, kind: output, shape index: {}, may-alias: {0,6}]  }
   0x1   :  { %1629 = sst [smem:[#allocation17_spill]] %s1615_s5 }
   0x2   :  { %1630 = sst [smem:[#allocation18_spill]] %s1616_s6 }
   0x3   :  { %11 = vsyncpa [#allocation3], 0 }
   0x4   :  { %13 = vsyncpa [#allocation3 + $0x1], 0 }
   0x5   :  { %14 = vsyncpa [#allocation5], 0 }
   0x6   :  { %15 = vsyncpa [#allocation4], 0 }
   0x7   :  { %17 = vsyncpa [#allocation4 + $0x1], 0  ;;  %s1220_s21 = smov 0   ;;  %s1222_s22 = smov 0  }
   0x8   :  { %s1224_s23 = smov 0   ;;  %s1226_s24 = smov 0  }
   0x9   :  { %s1228_s25 = smov 0   ;;  %s1230_s26 = smov 0  }
   0xa   :  { %s1232_s27 = smov 0   ;;  %s1234_s28 = smov 0  }
   0xb LB: > { %1631 = sst [smem:[#allocation11_spill]] %s1144_s21  ;;  %s891_s29 = sadd.s32 4294967295, %s1172_s28   ;;  %s1172_s28 = sphi %s1234_s28, %s23_s28   ;;  %s1168_s27 = sphi %s1232_s27, %s1661_s27   ;;  %s1164_s26 = sphi %s1230_s26, %s1660_s26   ;;  %s1160_s25 = sphi %s1228_s25, %s1659_s25   ;;  %s1156_s24 = sphi %s1226_s24, %s1654_s24   ;;  %s1152_s23 = sphi %s1224_s23, %s1658_s23   ;;  %s1148_s22 = sphi %s1222_s22, %s1657_s22   ;;  %s1144_s21 = sphi %s1220_s21, %s1656_s21  }
   0xc   : > { %1632 = sst [smem:[#allocation12_spill]] %s1164_s26  ;;  %s892_s30 = sadd.s32 4294967294, %s1172_s28  }
   0xd   : > { %1633 = sst [smem:[#allocation13_spill]] %s1172_s28  ;;  %p51_p0 = scmp.ne.s32.totalorder %s1152_s23, %s1148_s22 }
   0xe   : > { %p52_p1 = scmp.eq.s32.totalorder %s1172_s28, 0  ;;  %p57_p2 = scmp.ne.s32.totalorder %s1148_s22, %s1144_s21 }
   0xf   : > { %p1268_p3 = scmp.eq.s32.totalorder %s891_s29, 0  ;;  %p188_p4 = scmp.eq.s32.totalorder %s891_s29, 7 }
  0x10   : > { %p53_p5 = por %p52_p1, %p51_p0  ;;  %p194_p6 = scmp.eq.s32.totalorder %s892_s30, 7 }
  0x11   : > { %p1274_p7 = por %p1268_p3, %p57_p2  ;;  %p1278_p8 = por %p188_p4, %p51_p0 }
  0x12   : > { %p1282_p9 = por %p194_p6, %p57_p2  ;;  %p893_p10 = scmp.ge.s32.totalorder %s1172_s28, 1 }
  0x13   : > { %s1635_s9 = scalar_select %p1274_p7, 1, 0 }
  0x14   : > { %s1636_s10 = scalar_select %p1278_p8, 1, 0 }
  0x15   : > { %s1638_s11 = scalar_select %p1282_p9, 1, 0 }
  0x16   : > { %1637 = sst [smem:[#allocation14_spill]] %s1636_s10  ;;  %p201_p11 = scmp.lt.s32.totalorder %s1172_s28, 9 }
  0x17   : > { %1639 = sst [smem:[#allocation15_spill]] %s1638_s11  ;;  %s1640_s5 = sld [smem:[#allocation17_spill]] }
  0x18   : > { %p1291_p12 = pnand %p893_p10, %p201_p11  ;;  %p941_p13 = scmp.lt.s32.totalorder %s1172_s28, 8 }
  0x19   : > { %s32_s17 = sadd.s32 1, %s1164_s26 }
  0x1a   : > { %s1641_s15 = scalar_select %p1291_p12, 1, 0 }
  0x1b   : > { %p928_p0 = pneg %p1291_p12  ;;  %p1298_p1 = pnand %p941_p13, %p53_p5 }
  0x1d   : > { %s226_s14 = sshll.u32 %s1640_s5, 4  ;;  %p929_p2 = pnand %p928_p0, %p1268_p3  ;;  %s227_s14 = int_to_ptr.vmem [resolvable:$true] %s226_s14 }
  0x1e   : > { %s1025_s18 = scalar_lea.vmem %s227_s14, 16  ;;  %p1033_p11 = scmp.lt.s32.totalorder %s227_s14, %s227_s14 }
  0x1f   : > { %p1026_p4 = scmp.ne.s32.totalorder %s227_s14, %s1025_s18  ;;  %p1027_p6 = pneg %p929_p2 }
  0x20   : > { %p1034_p8 = scmp.lt.s32.totalorder %s1025_s18, %s1025_s18 }
  0x21   : > { %p1028_p9 = pnand %p1027_p6, %p1026_p4 }
  0x22   : > { %p1035_p7 = por %p1034_p8, %p1033_p11 }
  0x23   : > { %p1029_p10 = pneg %p1028_p9 }
  0x25   : > { %p1036_p12 = pnand %p1035_p7, %p1029_p10 }
  0x27   : > { %1039 = shalt.err (!%p1036_p12)
}
  0x28   : > { %s1174_s19 = smov [#allocation6]   ;;  %p33_p5 = scmp.ge.s32.totalorder %s32_s17, 2 }
  0x29   : > { %931 = dma.vmem_to_smem (!%p929_p2), %s227_s14, 16, %s1174_s19, [#allocation5]  }
  0x2a   : > { %s35_s20 = sadd.s32 1, %s1168_s27  ;;  %s237_s29 = sand.u32 1, %s1152_s23  }
  0x2b   : > { %s897_s30 = sshll.u32 %s1164_s26, 2  ;;  %s1663_s17 = smov (%p33_p5, %s32_s17), 0 }
  0x2c   : > { %1643 = sst [smem:[#allocation16_spill]] %s1663_s17  ;;  %s1665_s20 = smov (!%p33_p5, %s35_s20), %s1168_s27 }
  0x2d   : > { %s40_s12 = ssub.s32 %s1164_s26, %s1663_s17  ;;  %p37_p7 = scmp.ge.s32.totalorder %s1665_s20, 4 }
  0x2e   : > { %s896_s13 = sshll.u32 %s237_s29, 7  ;;  %s898_s18 = sshll.u32 %s1168_s27, 5 }
  0x2f   : > { %s1667_s20 = smov (%p37_p7, %s1665_s20), 0  ;;  %s247_s14 = sadd.s32 %s898_s18, %s897_s30 }
  0x30   : > { %s241_s19 = scalar_lea.vmem [#allocation2], %s896_s13  ;;  %s39_s5 = ssub.s32 %s1168_s27, %s1667_s20 }
  0x31   : > { %s250_s7 = sshll.u32 %s241_s19, 4  ;;  %s899_s11 = sshll.u32 %s247_s14, 7  ;;  %s1323_s7 = int_to_ptr.vmem [resolvable:$true] %s250_s7 }
  0x32   : > { %s41_s21 = sor.u32 %s40_s12, %s39_s5  ;;  %s1321_s6 = scalar_lea.hbm %s1610_s0, %s899_s11 }
  0x33   : > { %p42_p8 = scmp.eq.s32.totalorder %s41_s21, 0  ;;  %s1644_s17 = sadd.s32 1, %s1152_s23 }
  0x34   : > { %s1330_s30 = scalar_lea.sflag [#allocation3], %s237_s29  ;;  %s1040_s13 = scalar_lea.hbm %s1321_s6, 2048 }
  0x35   : > { %s1328_s26 = scalar_select %p42_p8, %s1152_s23, %s1644_s17  }
  0x36   : > { %p1041_p9 = scmp.ne.s32.totalorder %s1321_s6, %s1040_s13  ;;  %p1042_p12 = pneg %p1298_p1 }
  0x37   : > { %s1045_s10 = scalar_lea.hbm %s1610_s0, 16384  ;;  %p1046_p2 = scmp.lt.u32.totalorder %s1321_s6, %s1610_s0 }
  0x38   : > { %p1043_p13 = pnand %p1042_p12, %p1041_p9  ;;  %p1047_p4 = scmp.lt.u32.totalorder %s1045_s10, %s1040_s13 }
  0x39   : > { %p1049_p10 = scmp.lt.u32.totalorder %s1040_s13, %s1321_s6 }
  0x3a   : > { %p1044_p0 = pneg %p1043_p13  ;;  %p1048_p6 = por %p1047_p4, %p1046_p2 }
  0x3c   : > { %p1050_p11 = por %p1049_p10, %p1048_p6 }
  0x3e   : > { %p1051_p5 = pnand %p1050_p11, %p1044_p0 }
  0x40   : > { %1054 = shalt.err (!%p1051_p5)
}
  0x41   : > { %s1055_s17 = scalar_lea.vmem %s1323_s7, 2048  ;;  %s1175_s29 = smov [#allocation2]  }
  0x42   : > { %p1056_p7 = scmp.ne.s32.totalorder %s1323_s7, %s1055_s17  ;;  %s1060_s12 = sshll.u32 %s1175_s29, 4  ;;  %s1061_s12 = int_to_ptr.vmem [resolvable:$false] %s1060_s12 }
  0x43   : > { %s1062_s18 = scalar_lea.vmem %s1061_s12, 4096  ;;  %p1063_p13 = scmp.lt.s32.totalorder %s1323_s7, %s1061_s12 }
  0x44   : > { %p1058_p8 = pnand %p1056_p7, %p1042_p12  ;;  %p1064_p2 = scmp.lt.s32.totalorder %s1062_s18, %s1055_s17 }
  0x46   : > { %p1059_p9 = pneg %p1058_p8  ;;  %p1065_p4 = por %p1064_p2, %p1063_p13 }
  0x48   : > { %p1066_p6 = pnand %p1065_p4, %p1059_p9 }
  0x4a   : > { %1069 = shalt.err (!%p1066_p6)
}
  0x4b   : > { %s1176_s14 = smov 1024   ;;  %s1177_s19 = smov 512  }
  0x4c   : > { %s1178_s13 = smov 32   ;;  %p1645_p12 = scmp.ne.s32.totalorder %s1641_s15, 0 }
  0x4d   : > { %935 = dma.hbm_to_vmem [thread:$0]  (!%p1298_p1), %s1321_s6, 2048, %s1323_s7, %s1330_s30, %s1176_s14, %s1177_s19, %s1178_s13  }
  0x4e   : > { %262 = sbr.rel (%p1645_p12) target bundleno = 588 (0x24c), region = 44  ;;  %s1361_s5 = sand.u32 (!%p1645_p12), 1, %s1148_s22  }
  0x4f   : > { %s901_s28 = sshll.u32 (!%p1645_p12), %s1361_s5, 7  ;;  %s265_s10 = scalar_lea.sflag (!%p1645_p12), [#allocation3], %s1361_s5 }
  0x50   : > { %s1367_s21 = scalar_lea.vmem (!%p1645_p12), [#allocation2], %s901_s28  ;;  %p1646_p0 = scmp.ne.s32.totalorder (!%p1645_p12), %s1635_s9, 0 }
  0x55   : > { %1131 = dma.done.wait (%p1646_p0), %s265_s10, 2048  }
  0x56   : > { %1133 = vsyncadd (%p1646_p0), %s265_s10, 4294965248 }
  0x57   : > { %1135 = dma.done.wait (%p1268_p3), [#allocation5], 16  }
  0x58   : > { %1137 = vsyncadd (%p1268_p3), [#allocation5], 4294967280 }
  0x59   : > { %277 = sfence }
  0x5a   : > { %v1378_v0 = vld [vmem:[%s1367_s21 + $0x8] sm:$0xff]  ;;  %v1384_v2 = vld [vmem:[%s1367_s21 + $0x18] sm:$0xff]  ;;  %v1392_v5 = vld [vmem:[%s1367_s21] sm:$0xff]  ;;  %v1179_v7 = vmov 0   ;;  %v1180_v13 = vmov 1   ;;  %vm336_vm0 = vcmask 261120  }
  0x5b   : > { %v1381_v1 = vld [vmem:[%s1367_s21 + $0x28] sm:$0xff]  ;;  %v1389_v4 = vld [vmem:[%s1367_s21 + $0x38] sm:$0xff]  ;;  %v1395_v6 = vld [vmem:[%s1367_s21 + $0x20] sm:$0xff]  ;;  %372 = vmatprep.mubr.bf16.mxu0 %v1179_v7  ;;  %415 = vmatprep.mubr.bf16.mxu1 %v1179_v7  ;;  %s470_s13 = sld [smem:[#allocation6]]  ;;  %vm506_vm9 = vcmask 130048   ;;  %s913_s8 = sld [smem:[#allocation6 + $0x1]] }
  0x5c   : > { %v324_v3 = vpack.c.bf16 %v1381_v1, %v1378_v0  ;;  %v326_v8 = vpack.c.bf16 %v1389_v4, %v1384_v2  ;;  %v323_v9 = vpack.c.bf16 %v1395_v6, %v1392_v5  ;;  %v1404_v10 = vld [vmem:[%s1367_s21 + $0x10] sm:$0xff]  ;;  %v1410_v12 = vld [vmem:[%s1367_s21 + $0x48] sm:$0xff]  ;;  %1017 = vset.pattern.permute.xlu0 %v1179_v7  ;;  %1018 = vset.pattern.permute.xlu1 %v1180_v13  ;;  %v1419_v16 = vld [vmem:[%s1367_s21 + $0x58] sm:$0xff]  ;;  %s1491_s9 = scalar_lea.vmem [#allocation7], %s901_s28  ;;  %s915_s28 = sshll.u32 %s1156_s24, 2 }
  0x5d   : > { %v1407_v11 = vld [vmem:[%s1367_s21 + $0x30] sm:$0xff]  ;;  %v1416_v15 = vld [vmem:[%s1367_s21 + $0x68] sm:$0xff]  ;;  %v1422_v17 = vld [vmem:[%s1367_s21 + $0x78] sm:$0xff]  ;;  %s916_s15 = sshll.u32 %s1160_s25, 5  ;;  %s789_s16 = sshll.u32 %s1491_s9, 4  ;;  %s1549_s16 = int_to_ptr.vmem [resolvable:$true] %s789_s16 }
  0x5e   : > { %340 = vmatprep.subr.bf16.mxu0 %v324_v3  ;;  %v325_v14 = vpack.c.bf16 %v1407_v11, %v1404_v10  ;;  %383 = vmatprep.subr.bf16.mxu1 %v326_v8  ;;  %v328_v18 = vpack.c.bf16 %v1416_v15, %v1410_v12  ;;  %v330_v19 = vpack.c.bf16 %v1422_v17, %v1419_v16  ;;  %v1429_v20 = vld [vmem:[%s1367_s21 + $0x40] sm:$0xff]  ;;  %v1435_v22 = vld [vmem:[%s1367_s21 + $0x50] sm:$0xff]  ;;  %v427_v28 = vld [vmem:[%s1612_s2 + $0x8] sm:$0xff]  ;;  %s1527_s24 = sadd.s32 %s916_s15, %s915_s28  ;;  %s1647_s17 = sld [smem:[#allocation18_spill]] }
  0x5f   : > { %341 = vmatpush1.bf16.msra.mxu0 %v323_v9  ;;  %v1432_v21 = vld [vmem:[%s1367_s21 + $0x60] sm:$0xff]  ;;  %v1440_v24 = vld [vmem:[%s1367_s21 + $0x70] sm:$0xff]  ;;  %v620_v31 = vld [vmem:[%s1614_s4 + $0x8] sm:$0xff]  ;;  %s917_s25 = sshll.u32 %s1527_s24, 7  ;;  %s1648_s12 = sld [smem:[#allocation14_spill]] }
  0x60   : > { %384 = vmatpush1.bf16.msra.mxu1 %v325_v14  ;;  %v327_v23 = vpack.c.bf16 %v1432_v21, %v1429_v20  ;;  %342 = vmatprep.subr.bf16.mxu0 %v328_v18  ;;  %v329_v25 = vpack.c.bf16 %v1440_v24, %v1435_v22  ;;  %v426_v26 = vld [vmem:[%s1612_s2] sm:$0xff]  ;;  %v621_v30 = vld [vmem:[%s1614_s4 + $0x10] sm:$0xff]  ;;  %v622_v32 = vld [vmem:[%s1614_s4 + $0x18] sm:$0xff]  ;;  %s774_s18 = scalar_lea.sflag [#allocation4], %s1361_s5  ;;  %s1070_s14 = scalar_lea.vmem %s1549_s16, 2048 }
  0x61   : > { %385 = vmatprep.subr.bf16.mxu1 %v330_v19  ;;  %v1022_v27 = vld [vmem:[%s1611_s1] sm:$0xff]   ;;  %430 = vperm.xlu0 %1017, %v426_v26   ;;  %v471_v40 = vstv %s470_s13  ;;  %p1071_p3 = scmp.ne.s32.totalorder %s1549_s16, %s1070_s14  ;;  %s1181_s19 = smov [#allocation7]  }
  0x62   : > { %447 = vperm.xlu1 %1018, %v426_v26   ;;  %v619_v29 = vld [vmem:[%s1614_s4] sm:$0xff]  ;;  %s1074_s13 = sshll.u32 %s1181_s19, 4  ;;  %s1075_s13 = int_to_ptr.vmem [resolvable:$false] %s1074_s13 }
  0x63   : > { %343 = vmatpush1.bf16.msra.mxu0 %v327_v23  ;;  %s1076_s10 = scalar_lea.vmem %s1075_s13, 4096  ;;  %p1077_p5 = scmp.lt.s32.totalorder %s1549_s16, %s1075_s13 }
  0x64   : > { %386 = vmatpush1.bf16.msra.mxu1 %v329_v25  ;;  %s1546_s29 = scalar_lea.hbm %s1647_s17, %s917_s25  ;;  %p1078_p7 = scmp.lt.s32.totalorder %s1076_s10, %s1070_s14 }
  0x65   : > { %435 = vperm.xlu0 %1017, %v427_v28   ;;  %p1649_p1 = scmp.ne.s32.totalorder %s1648_s12, 0 }
  0x66   : > { %905 = vmatmul.mubr.msk.bf16.vlgmr.msra.gmra.mrb[0].mxu0 %vm336_vm0, %v1022_v27  ;;  %451 = vperm.xlu1 %1018, %v427_v28   ;;  %p1079_p8 = por %p1078_p7, %p1077_p5 }
  0x67   : > { %906 = vmatmul.mubr.msk.bf16.vlgmr.msra.gmra.mrb[0].mxu1 %vm336_vm0, %v1022_v27  ;;  %545 = vmatprep.mubr.bf16.mxu0 %v1179_v7  ;;  %p1072_p10 = pnand %p1071_p3, %p1649_p1 }
  0x68   : > { %598 = vmatprep.mubr.bf16.mxu1 %v1179_v7 }
  0x69   : > { %625 = vperm.xlu0 %1017, %v619_v29   ;;  %p1073_p11 = pneg %p1072_p10 }
  0x6a   : > { %1019 = vset.pattern.permute.xlu1 %v1179_v7 }
  0x6b   : > { %630 = vperm.xlu1 %1019, %v620_v31   ;;  %p1080_p9 = pnand %p1079_p8, %p1073_p11 }
  0x6d   : > { %635 = vperm.xlu0 %1017, %v621_v30  }
  0x6f   : > { %640 = vperm.xlu1 %1019, %v622_v32  }
  0x71   : > { %1020 = vset.pattern.permute.xlu0 %v1180_v13 }
  0x72   : > { %660 = vperm.xlu0 %1020, %v619_v29  }
  0x73   : > { %1021 = vset.pattern.permute.xlu1 %v1180_v13 }
  0x74   : > { %664 = vperm.xlu1 %1021, %v620_v31  }
  0x76   : > { %672 = vperm.xlu0 %1020, %v622_v32  }
  0x78   : > { %668 = vperm.xlu1 %1021, %v621_v30  }
  0xe0   : > { %v431_v33 = vpop.permute.xlu0 %430 }
  0xe1   : > { %v448_v34 = vpop.permute.xlu1 %447 }
  0xe4   : > { %v436_v35 = vpop.permute.xlu0 %435 }
  0xe5   : > { %v452_v51 = vpop.permute.xlu1 %451 }
 0x139   : > { %v374_v36 = vpop.f32.mrb[0].mxu0 }
 0x13a   : > { %v438_v37 = vmul.f32 %v431_v33, %v374_v36  ;;  %v417_v38 = vpop.f32.mrb[0].mxu1  ;;  %v376_v39 = vpop.f32.mrb[1].mxu0  ;;  %v1024_v36 = vld [vmem:[%s1613_s3 + $0x8] sm:$0xff]  }
 0x13b   : > { %v440_v41 = vmul.f32 %v431_v33, %v417_v38  ;;  %v439_v42 = vmul.f32 %v431_v33, %v376_v39  ;;  %v419_v43 = vpop.f32.mrb[1].mxu1  ;;  %v378_v44 = vpop.f32.mrb[2].mxu0 }
 0x13c   : > { %v454_v45 = vadd.f32 %v448_v34, %v438_v37  ;;  %v441_v46 = vmul.f32 %v431_v33, %v419_v43  ;;  %v442_v47 = vmul.f32 %v436_v35, %v378_v44  ;;  %v421_v48 = vpop.f32.mrb[2].mxu1  ;;  %v380_v49 = vpop.f32.mrb[3].mxu0 }
 0x13d   : > { %v456_v50 = vadd.f32 %v448_v34, %v440_v41  ;;  %v455_v52 = vadd.f32 %v448_v34, %v439_v42  ;;  %v444_v53 = vmul.f32 %v436_v35, %v421_v48  ;;  %v443_v54 = vmul.f32 %v436_v35, %v380_v49  ;;  %v423_v55 = vpop.f32.mrb[3].mxu1  ;;  %v626_v37 = vpop.permute.xlu0 %625 }
 0x13e   : > { %v472_v56 = vmul.f32 %v471_v40, %v454_v45  ;;  %v458_v57 = vadd.f32 %v452_v51, %v442_v47  ;;  %vm462_vm1 = vcmp.gt.f32.partialorder %v454_v45, 0.0  ;;  %v457_v59 = vadd.f32 %v448_v34, %v441_v46  ;;  %v631_v38 = vpop.permute.xlu1 %630 }
 0x13f   : > { %v474_v58 = vmul.f32 %v471_v40, %v456_v50  ;;  %v473_v60 = vmul.f32 %v471_v40, %v455_v52  ;;  %v460_v62 = vadd.f32 %v452_v51, %v444_v53  ;;  %v459_v63 = vadd.f32 %v452_v51, %v443_v54 }
 0x140   : > { %vm466_vm2 = vcmp.gt.f32.partialorder %v458_v57, 0.0  ;;  %v476_v61 = vmul.f32 %v471_v40, %v458_v57  ;;  %v480_v3 = vsel %vm462_vm1, %v454_v45, %v472_v56  ;;  %vm464_vm3 = vcmp.gt.f32.partialorder %v456_v50, 0.0 }
 0x141   : > { %vm463_vm4 = vcmp.gt.f32.partialorder %v455_v52, 0.0  ;;  %v445_v8 = vmul.f32 %v436_v35, %v423_v55  ;;  %vm468_vm5 = vcmp.gt.f32.partialorder %v460_v62, 0.0  ;;  %v478_v13 = vmul.f32 %v471_v40, %v460_v62  ;;  %v1023_v35 = vld [vmem:[%s1613_s3] sm:$0xff]   ;;  %v1476_v39 = vpop.permute.xlu0 %635 }
 0x142   : > { %v484_v9 = vsel %vm466_vm2, %v458_v57, %v476_v61  ;;  %vm467_vm6 = vcmp.gt.f32.partialorder %v459_v63, 0.0  ;;  %v475_v14 = vmul.f32 %v471_v40, %v457_v59  ;;  %v477_v18 = vmul.f32 %v471_v40, %v459_v63 }
 0x143   : > { %v461_v19 = vadd.f32 %v452_v51, %v445_v8  ;;  %v492_v23 = vpack.c.bf16 %v484_v9, %v480_v3  ;;  %v482_v25 = vsel %vm464_vm3, %v456_v50, %v474_v58  ;;  %vm465_vm7 = vcmp.gt.f32.partialorder %v457_v59, 0.0 }
 0x144   : > { %v486_v26 = vsel %vm468_vm5, %v460_v62, %v478_v13  ;;  %v481_v27 = vsel %vm463_vm4, %v455_v52, %v473_v60  ;;  %v485_v29 = vsel %vm467_vm6, %v459_v63, %v477_v18  ;;  %v483_v32 = vsel %vm465_vm7, %v457_v59, %v475_v14 }
 0x145   : > { %vm469_vm8 = vcmp.gt.f32.partialorder %v461_v19, 0.0  ;;  %v479_v28 = vmul.f32 %v471_v40, %v461_v19  ;;  %v494_v30 = vpack.c.bf16 %v486_v26, %v482_v25  ;;  %v493_v31 = vpack.c.bf16 %v485_v29, %v481_v27  ;;  %v1478_v40 = vpop.permute.xlu1 %640  ;;  %v661_v42 = vpop.permute.xlu0 %660 }
 0x147   : > { %v487_v33 = vsel %vm469_vm8, %v461_v19, %v479_v28  ;;  %513 = vmatprep.subr.bf16.mxu0 %v493_v31 }
 0x148   : > { %v495_v34 = vpack.c.bf16 %v487_v33, %v483_v32  ;;  %514 = vmatpush1.bf16.msra.mxu0 %v492_v23 }
 0x149   : > { %v665_v57 = vpop.permute.xlu1 %664 }
 0x14a   : > { %566 = vmatprep.subr.bf16.mxu1 %v495_v34 }
 0x14b   : > { %567 = vmatpush1.bf16.msra.mxu1 %v494_v30  ;;  %909 = vmatmul.mubr.msk.bf16.vlgmr.msra.gmra.mrb[4].mxu0 %vm506_vm9, %v1023_v35 }
 0x14c   : > { %555 = vmatprep.mubr.bf16.mxu0 %v1179_v7 }
 0x14e   : > { %911 = vmatmul.mubr.msk.bf16.vlgmr.msra.gmra.mrb[4].mxu1 %vm506_vm9, %v1023_v35 }
 0x14f   : > { %608 = vmatprep.mubr.bf16.mxu1 %v1179_v7  ;;  %v1480_v7 = vstv %s913_s8 }
 0x153   : > { %910 = vmatmul.mubr.msk.bf16.gmra.mrb[8].mxu0 %vm506_vm9, %v1024_v36 }
 0x156   : > { %912 = vmatmul.mubr.msk.bf16.gmra.mrb[8].mxu1 %vm506_vm9, %v1024_v36 }
 0x21e   : > { %v547_v41 = vpop.f32.mrb[4].mxu0 }
 0x21f   : > { %v643_v43 = vmul.f32 %v626_v37, %v547_v41  ;;  %v549_v44 = vpop.f32.mrb[5].mxu0 }
 0x220   : > { %v644_v46 = vmul.f32 %v626_v37, %v549_v44  ;;  %v551_v47 = vpop.f32.mrb[6].mxu0 }
 0x221   : > { %v600_v45 = vpop.f32.mrb[4].mxu1  ;;  %v675_v50 = vadd.f32 %v661_v42, %v643_v43  ;;  %v647_v51 = vmul.f32 %v631_v38, %v551_v47  ;;  %v553_v52 = vpop.f32.mrb[7].mxu0 }
 0x222   : > { %v645_v48 = vmul.f32 %v626_v37, %v600_v45  ;;  %v602_v49 = vpop.f32.mrb[5].mxu1  ;;  %v676_v54 = vadd.f32 %v661_v42, %v644_v46  ;;  %v648_v56 = vmul.f32 %v631_v38, %v553_v52  ;;  %v669_v45 = vpop.permute.xlu1 %668 }
 0x223   : > { %v646_v53 = vmul.f32 %v626_v37, %v602_v49  ;;  %v604_v55 = vpop.f32.mrb[6].mxu1  ;;  %vm691_vm10 = vcmp.gt.f32.partialorder %v675_v50, 0.0  ;;  %v709_v59 = vmul.f32 %v1480_v7, %v675_v50  ;;  %v679_v13 = vadd.f32 %v665_v57, %v647_v51 }
 0x224   : > { %v677_v58 = vadd.f32 %v661_v42, %v645_v48  ;;  %v649_v60 = vmul.f32 %v631_v38, %v604_v55  ;;  %v606_v61 = vpop.f32.mrb[7].mxu1  ;;  %vm692_vm11 = vcmp.gt.f32.partialorder %v676_v54, 0.0  ;;  %v710_v63 = vmul.f32 %v1480_v7, %v676_v54 }
 0x225   : > { %v678_v62 = vadd.f32 %v661_v42, %v646_v53  ;;  %v650_v3 = vmul.f32 %v631_v38, %v606_v61  ;;  %v725_v9 = vsel %vm691_vm10, %v675_v50, %v709_v59  ;;  %v680_v27 = vadd.f32 %v665_v57, %v648_v56 }
 0x226   : > { %vm693_vm12 = vcmp.gt.f32.partialorder %v677_v58, 0.0  ;;  %v711_v8 = vmul.f32 %v1480_v7, %v677_v58  ;;  %v726_v18 = vsel %vm692_vm11, %v676_v54, %v710_v63  ;;  %v741_v19 = vadd.f32 %v725_v9, %v1392_v5  ;;  %v557_v23 = vpop.f32.mrb[8].mxu0 }
 0x227   : > { %vm694_vm13 = vcmp.gt.f32.partialorder %v678_v62, 0.0  ;;  %v712_v14 = vmul.f32 %v1480_v7, %v678_v62  ;;  %v742_v26 = vadd.f32 %v726_v18, %v1378_v0  ;;  %v681_v28 = vadd.f32 %v665_v57, %v649_v60  ;;  %v559_v29 = vpop.f32.mrb[9].mxu0 }
 0x228   : > { %v727_v25 = vsel %vm693_vm12, %v677_v58, %v711_v8  ;;  %757 = vst [vmem:[%s1491_s9] sm:$0xff] %v741_v19  ;;  %v682_v32 = vadd.f32 %v665_v57, %v650_v3  ;;  %vm695_vm14 = vcmp.gt.f32.partialorder %v679_v13, 0.0  ;;  %v561_v33 = vpop.f32.mrb[10].mxu0  ;;  %vm696_vm15 = vcmp.gt.f32.partialorder %v680_v27, 0.0 }
 0x229   : > { %v728_v30 = vsel %vm694_vm13, %v678_v62, %v712_v14  ;;  %v743_v31 = vadd.f32 %v727_v25, %v1404_v10  ;;  %v610_v5 = vpop.f32.mrb[8].mxu1  ;;  %758 = vst [vmem:[%s1491_s9 + $0x8] sm:$0xff] %v742_v26  ;;  %vm697_vm0 = vcmp.gt.f32.partialorder %v681_v28, 0.0  ;;  %v713_v34 = vmul.f32 %v1480_v7, %v679_v13  ;;  %v563_v35 = vpop.f32.mrb[11].mxu0 }
 0x22a   : > { %v744_v0 = vadd.f32 %v728_v30, %v1384_v2  ;;  %v612_v10 = vpop.f32.mrb[9].mxu1  ;;  %vm698_vm1 = vcmp.gt.f32.partialorder %v682_v32, 0.0  ;;  %v714_v36 = vmul.f32 %v1480_v7, %v680_v27  ;;  %v715_v37 = vmul.f32 %v1480_v7, %v681_v28  ;;  %v673_v62 = vpop.permute.xlu0 %672 }
 0x22b   : > { %759 = vst [vmem:[%s1491_s9 + $0x10] sm:$0xff] %v743_v31  ;;  %v716_v38 = vmul.f32 %v1480_v7, %v682_v32  ;;  %v614_v41 = vpop.f32.mrb[10].mxu1  ;;  %v729_v2 = vsel %vm695_vm14, %v679_v13, %v713_v34  ;;  %v651_v42 = vmul.f32 %v1476_v39, %v557_v23  ;;  %v653_v43 = vmul.f32 %v1476_v39, %v610_v5 }
 0x22c   : > { %760 = vst [vmem:[%s1491_s9 + $0x18] sm:$0xff] %v744_v0  ;;  %v652_v44 = vmul.f32 %v1476_v39, %v559_v29  ;;  %v616_v46 = vpop.f32.mrb[11].mxu1  ;;  %v730_v47 = vsel %vm696_vm15, %v680_v27, %v714_v36  ;;  %v731_v48 = vsel %vm697_vm0, %v681_v28, %v715_v37  ;;  %v745_v50 = vadd.f32 %v729_v2, %v1395_v6 }
 0x22d   : > { %v732_v49 = vsel %vm698_vm1, %v682_v32, %v716_v38  ;;  %v746_v51 = vadd.f32 %v730_v47, %v1381_v1  ;;  %v747_v52 = vadd.f32 %v731_v48, %v1407_v11  ;;  %v654_v54 = vmul.f32 %v1476_v39, %v612_v10 }
 0x22e   : > { %v748_v53 = vadd.f32 %v732_v49, %v1389_v4  ;;  %761 = vst [vmem:[%s1491_s9 + $0x20] sm:$0xff] %v745_v50  ;;  %v683_v55 = vadd.f32 %v669_v45, %v651_v42  ;;  %v684_v56 = vadd.f32 %v669_v45, %v652_v44  ;;  %v685_v57 = vadd.f32 %v669_v45, %v653_v43 }
 0x22f   : > { %v655_v58 = vmul.f32 %v1478_v40, %v561_v33  ;;  %762 = vst [vmem:[%s1491_s9 + $0x28] sm:$0xff] %v746_v51  ;;  %763 = vst [vmem:[%s1491_s9 + $0x30] sm:$0xff] %v747_v52  ;;  %v686_v6 = vadd.f32 %v669_v45, %v654_v54  ;;  %v657_v1 = vmul.f32 %v1478_v40, %v614_v41 }
 0x230   : > { %764 = vst [vmem:[%s1491_s9 + $0x38] sm:$0xff] %v748_v53  ;;  %v656_v11 = vmul.f32 %v1478_v40, %v563_v35  ;;  %v658_v4 = vmul.f32 %v1478_v40, %v616_v46  ;;  %vm699_vm2 = vcmp.gt.f32.partialorder %v683_v55, 0.0  ;;  %vm700_vm3 = vcmp.gt.f32.partialorder %v684_v56, 0.0 }
 0x231   : > { %vm701_vm4 = vcmp.gt.f32.partialorder %v685_v57, 0.0  ;;  %v717_v39 = vmul.f32 %v1480_v7, %v683_v55  ;;  %vm702_vm5 = vcmp.gt.f32.partialorder %v686_v6, 0.0  ;;  %v718_v59 = vmul.f32 %v1480_v7, %v684_v56 }
 0x232   : > { %v719_v60 = vmul.f32 %v1480_v7, %v685_v57  ;;  %v720_v61 = vmul.f32 %v1480_v7, %v686_v6  ;;  %v687_v3 = vadd.f32 %v673_v62, %v655_v58  ;;  %v688_v40 = vadd.f32 %v673_v62, %v656_v11 }
 0x233   : > { %v733_v63 = vsel %vm699_vm2, %v683_v55, %v717_v39  ;;  %v689_v8 = vadd.f32 %v673_v62, %v657_v1  ;;  %v734_v9 = vsel %vm700_vm3, %v684_v56, %v718_v59  ;;  %v690_v26 = vadd.f32 %v673_v62, %v658_v4 }
 0x234   : > { %v735_v13 = vsel %vm701_vm4, %v685_v57, %v719_v60  ;;  %v736_v14 = vsel %vm702_vm5, %v686_v6, %v720_v61  ;;  %v749_v18 = vadd.f32 %v733_v63, %v1429_v20  ;;  %v750_v19 = vadd.f32 %v734_v9, %v1410_v12 }
 0x235   : > { %v751_v23 = vadd.f32 %v735_v13, %v1435_v22  ;;  %v752_v25 = vadd.f32 %v736_v14, %v1419_v16  ;;  %vm703_vm6 = vcmp.gt.f32.partialorder %v687_v3, 0.0  ;;  %vm704_vm7 = vcmp.gt.f32.partialorder %v688_v40, 0.0 }
 0x236   : > { %765 = vst [vmem:[%s1491_s9 + $0x40] sm:$0xff] %v749_v18  ;;  %vm705_vm8 = vcmp.gt.f32.partialorder %v689_v8, 0.0  ;;  %v721_v27 = vmul.f32 %v1480_v7, %v687_v3  ;;  %766 = vst [vmem:[%s1491_s9 + $0x48] sm:$0xff] %v750_v19  ;;  %vm706_vm9 = vcmp.gt.f32.partialorder %v690_v26, 0.0  ;;  %v722_v12 = vmul.f32 %v1480_v7, %v688_v40 }
 0x237   : > { %767 = vst [vmem:[%s1491_s9 + $0x50] sm:$0xff] %v751_v23  ;;  %768 = vst [vmem:[%s1491_s9 + $0x58] sm:$0xff] %v752_v25  ;;  %v723_v16 = vmul.f32 %v1480_v7, %v689_v8  ;;  %v724_v20 = vmul.f32 %v1480_v7, %v690_v26 }
 0x238   : > { %v737_v22 = vsel %vm703_vm6, %v687_v3, %v721_v27  ;;  %v738_v28 = vsel %vm704_vm7, %v688_v40, %v722_v12 }
 0x239   : > { %v739_v29 = vsel %vm705_vm8, %v689_v8, %v723_v16  ;;  %v740_v30 = vsel %vm706_vm9, %v690_v26, %v724_v20  ;;  %v753_v31 = vadd.f32 %v737_v22, %v1432_v21  ;;  %v754_v32 = vadd.f32 %v738_v28, %v1416_v15 }
 0x23a   : > { %v755_v7 = vadd.f32 %v739_v29, %v1440_v24  ;;  %v756_v5 = vadd.f32 %v740_v30, %v1422_v17 }
 0x23b   : > { %769 = vst [vmem:[%s1491_s9 + $0x60] sm:$0xff] %v753_v31  ;;  %770 = vst [vmem:[%s1491_s9 + $0x68] sm:$0xff] %v754_v32 }
 0x23c   : > { %771 = vst [vmem:[%s1491_s9 + $0x70] sm:$0xff] %v755_v7  ;;  %772 = vst [vmem:[%s1491_s9 + $0x78] sm:$0xff] %v756_v5 }
 0x23d   : > { %1083 = shalt.err (!%p1080_p9)
}
 0x23e   : > { %s1084_s21 = scalar_lea.hbm %s1546_s29, 2048  ;;  %s1088_s8 = scalar_lea.hbm %s1647_s17, 16384 }
 0x23f   : > { %p1085_p13 = scmp.ne.s32.totalorder %s1546_s29, %s1084_s21  ;;  %p1089_p6 = scmp.lt.u32.totalorder %s1546_s29, %s1647_s17 }
 0x240   : > { %p1090_p12 = scmp.lt.u32.totalorder %s1088_s8, %s1084_s21  ;;  %p1092_p3 = scmp.lt.u32.totalorder %s1084_s21, %s1546_s29 }
 0x241   : > { %p1086_p2 = pnand %p1085_p13, %p1649_p1 }
 0x242   : > { %p1091_p0 = por %p1090_p12, %p1089_p6 }
 0x243   : > { %p1087_p4 = pneg %p1086_p2 }
 0x244   : > { %p1093_p10 = por %p1092_p3, %p1091_p0 }
 0x246   : > { %p1094_p11 = pnand %p1093_p10, %p1087_p4 }
 0x248   : > { %1097 = shalt.err (!%p1094_p11)
}
 0x249   : > { %s1182_s15 = smov 512   ;;  %s1183_s24 = smov 1024  }
 0x24a   : > { %s1184_s25 = smov 32  }
 0x24b   : > { %926 = dma.vmem_to_hbm [thread:$0]  (%p1649_p1), %s1549_s16, 2048, %s1546_s29, %s774_s18, %s1182_s15, %s1183_s24, %s1184_s25  }
 0x24c PF: > { %s1650_s30 = sld [smem:[#allocation13_spill]]  ;;  %s1651_s11 = sld [smem:[#allocation11_spill]] }
 0x24d   : > { %s1652_s14 = sld [smem:[#allocation15_spill]] }
 0x252   : > { %p943_p5 = scmp.ge.s32.totalorder %s1650_s30, 2  ;;  %s804_s19 = sand.u32 1, %s1651_s11  }
 0x253   : > { %p1653_p7 = scmp.ne.s32.totalorder %s1652_s14, 0  ;;  %s805_s13 = scalar_lea.sflag [#allocation4], %s804_s19 }
 0x255   : > { %p937_p8 = pnand %p943_p5, %p1653_p7 }
 0x257   : > { %1139 = dma.done.wait (!%p937_p8), %s805_s13, 2048  }
 0x258   : > { %1141 = vsyncadd (!%p937_p8), %s805_s13, 4294965248  ;;  %s23_s28 = sadd.s32 1, %s1650_s30   ;;  %s1654_s24 = sld [smem:[#allocation12_spill]] }
 0x259   : > { %p20_p9 = scmp.ge.s32.totalorder %s23_s28, 10   ;;  %s1655_s5 = sld [smem:[#allocation16_spill]] }
 0x25a   : > { %s1656_s21 = smov %s1148_s22  ;;  %s1657_s22 = smov %s1152_s23 }
 0x25b   : > { %s1658_s23 = smov %s1328_s26  ;;  %s1659_s25 = smov %s1168_s27 }
 0x25c   : > { %s1661_s27 = smov %s1667_s20  ;;  %22 = sbr.rel (!%p20_p9) target bundleno = 11 (0xb), region = 94 }
 0x25f   : > { %s1660_s26 = smov %s1655_s5 }
 0x263   :  { %810 = vsyncpa [#allocation3], 1 }
 0x264   :  { %812 = vsyncpa [#allocation3 + $0x1], 1 }
 0x265   :  { %813 = vsyncpa [#allocation4], 1 }
 0x266   :  { %815 = vsyncpa [#allocation4 + $0x1], 1 }
 0x267   :  { %816 = vsyncpa [#allocation5], 1 }
 0x268   :  { %818 = vsyncpa [#allocation5 + $0x1], 1 }

</bundles_post_ra>
